<compile_context>
chip_gen: v6e
topology: v6e:2x2x1
jax: 0.10.0
libtpu: 0.0.40
codegen_flags: <defaults>
</compile_context>

<pallas_src>
import functools

import jax
import jax.numpy as jnp
from jax import lax
from jax.experimental import pallas as pl
from jax.experimental.pallas import tpu as pltpu


# --------------------------------------------------------------------------
# Per-generation VMEM budget and tile selection
# --------------------------------------------------------------------------
def _vmem_limit_bytes():
    """Scoped-VMEM limit: ~3/4 of physical VMEM, capped at 96 MiB.
    v5e/v6e (128 MiB physical) -> 96 MiB; v7x (64 MiB physical) -> 48 MiB."""
    cap = None
    try:
        cap = getattr(pltpu.get_tpu_info(), "vmem_capacity_bytes", None)
    except Exception:
        cap = None
    if not cap:
        cap = 64 * 1024 * 1024          # conservative fallback (v7x physical)
    return min((int(cap) * 3) // 4, 96 * 1024 * 1024)


def _tile_candidates(dim):
    """Descending tile sizes for one dim: the full dim (always a legal block)
    followed by every divisor of `dim` that is a multiple of 128 (so the tile
    is legal on both the lane and sublane axis)."""
    cands = [dim]
    t = (dim // 128) * 128
    while t >= 128:
        if t != dim and dim % t == 0:
            cands.append(t)
        t -= 128
    return cands


def _block_bytes(tm, tn, tk, q_rows, y_bytes):
    """Worst-case VMEM footprint of one grid generation: double-buffered
    inputs/outputs + f32 accumulator + quantile-change scratch."""
    x_blk = tm * tk * 2                       # bf16
    w_blk = tn * tk * 2                       # bf16
    b_blk = tn * 4                            # f32 bias row
    q_blk = q_rows * tn * 4                   # f32 quantile row block
    y_blk = tm * tn * y_bytes
    acc = tm * tn * 4
    return 2 * (x_blk + w_blk + b_blk + q_blk) + 2 * (y_blk + q_blk) + acc + q_blk


def _select_tiles(B, Fout, Fin, q_rows, y_bytes, budget):
    """Largest blocks that fit `budget`.  The search shrinks tk first (no extra
    HBM re-reads), then tn (x re-read factor Fout/tn), then tm last (W is
    re-streamed B/tm times, the main memory-bound lever)."""
    cm, cn, ck = _tile_candidates(B), _tile_candidates(Fout), _tile_candidates(Fin)
    for tm in cm:
        for tn in cn:
            for tk in ck:
                if _block_bytes(tm, tn, tk, q_rows, y_bytes) <= budget:
                    return tm, tn, tk
    # TODO(synk): large ragged dims (not 128-multiples) can only use full-dim
    # blocks without masked (cdiv) edge tiles; fall back to the smallest combo.
    return cm[-1], cn[-1], ck[-1]


# --------------------------------------------------------------------------
# Kernel 1: tiled linear  y = x @ W^T + b        grid = (N, M, K), K innermost
# --------------------------------------------------------------------------
def _linear_kernel(x_ref, w_ref, b_ref, y_ref, acc_ref):
    k = pl.program_id(2)

    @pl.when(k == 0)
    def _():
        acc_ref[...] = jnp.zeros_like(acc_ref)

    # x: (tm, tk) bf16, w: (tn, tk) bf16 -> contract both dim 1 (x @ w.T), f32 acc.
    acc_ref[...] += lax.dot_general(
        x_ref[...], w_ref[...],
        dimension_numbers=(((1,), (1,)), ((), ())),
        preferred_element_type=jnp.float32)

    @pl.when(k == pl.num_programs(2) - 1)
    def _():
        y_ref[...] = (acc_ref[...] + b_ref[...]).astype(y_ref.dtype)


# --------------------------------------------------------------------------
# Kernel 2: linear + fused streaming-quantile update epilogue
# --------------------------------------------------------------------------
def _linear_quantile_kernel(x_ref, w_ref, b_ref, q_ref,
                            y_ref, qnew_ref, acc_ref, ch_ref, *, batch_size):
    i = pl.program_id(1)              # M (batch) tile
    k = pl.program_id(2)              # K (reduction) tile
    ni = pl.num_programs(1)
    nk = pl.num_programs(2)

    @pl.when(k == 0)
    def _():
        acc_ref[...] = jnp.zeros_like(acc_ref)

    @pl.when(jnp.logical_and(i == 0, k == 0))
    def _():
        ch_ref[...] = jnp.zeros_like(ch_ref)   # per-N-tile change accumulator

    acc_ref[...] += lax.dot_general(
        x_ref[...], w_ref[...],
        dimension_numbers=(((1,), (1,)), ((), ())),
        preferred_element_type=jnp.float32)

    @pl.when(k == nk - 1)
    def _():
        # Finish this y tile (f32) and write it out.
        y = acc_ref[...] + b_ref[...]                      # (tm, tn) f32
        y_ref[...] = y.astype(y_ref.dtype)

        # Quantile-update epilogue, all 2-D and lane-dense (channels on lanes).
        # Per sample/channel/quantile qi (reference math):
        #   change = over*(1+qi) - (1-over)*(Q-qi) = over*(Q+1) - (Q-qi)
        # so summing over this tile's tm rows:
        #   (Q+1)*count(y >= q[qi]) - tm*(Q-qi)
        q = q_ref[...]                                     # (Q, tn) f32
        Q = q.shape[0]
        tm = y.shape[0]
        rows = []
        for qi in range(Q):          # Q is tiny & static (e.g. 5): fully unrolled
            over = (y >= q[qi:qi + 1, :]).astype(jnp.float32)     # (tm, tn)
            cnt = jnp.sum(over, axis=0, keepdims=True)            # (1, tn)
            rows.append((Q + 1.0) * cnt - float(tm * (Q - qi)))
        ch_ref[...] += jnp.concatenate(rows, axis=0)              # (Q, tn)

    @pl.when(jnp.logical_and(i == ni - 1, k == nk - 1))
    def _():
        # Finalize: new_q = q + (s / (Q+1)) * (sum_b changes) / B
        # s intentionally uses rows Q-1 and 1, matching the reference's
        # quantiles[:, -1] - quantiles[:, 1].
        q = q_ref[...]                                     # (Q, tn)
        Q = q.shape[0]
        s = (q[Q - 1:Q, :] - q[1:2, :]) * (1.0 / (10.0 * (Q + 2)))   # (1, tn)
        qnew_ref[...] = q + ch_ref[...] * s * (1.0 / ((Q + 1) * batch_size))


# --------------------------------------------------------------------------
# Wrapper
# --------------------------------------------------------------------------
def linear_st_pallas(x, w, b, quantiles=None, out_dtype=jnp.float32):
    """Tiled y = x @ w.T + b; if `quantiles` (lane-dense (Q, out_features) f32,
    i.e. the transpose of the module's buffer) is given, the streaming-quantile
    update is fused as an epilogue and (y, new_quantiles) is returned.
    Set out_dtype=jnp.bfloat16 to halve the y HBM writeback if the consumer
    tolerates it (default f32 preserves the module's numerics)."""
    B, Fin = x.shape
    Fout, Fin2 = w.shape
    assert Fin == Fin2

    Q = 0 if quantiles is None else quantiles.shape[0]
    vmem_limit = _vmem_limit_bytes()
    y_bytes = jnp.dtype(out_dtype).itemsize
    budget = (vmem_limit * 7) // 8       # headroom for compiler-internal scratch
    tm, tn, tk = _select_tiles(B, Fout, Fin, Q, y_bytes, budget)

    # v7x megacore balance: in the fused path only the N axis is "parallel"
    # (the change accumulator persists across M), so give it >= 2 tiles when
    # that is free (Fout a multiple of 256).
    if quantiles is not None and Fout // tn == 1 and Fout % 256 == 0:
        tn = Fout // 2

    grid = (Fout // tn, B // tm, Fin // tk)      # (N, M, K): K innermost reduction

    # bf16 operands -> full-rate MXU; bias / accumulator / epilogue stay f32.
    x_bf = x.astype(jnp.bfloat16)
    w_bf = w.astype(jnp.bfloat16)                # no wrapper-side transpose of W
    b2 = b.reshape(1, Fout).astype(jnp.float32)

    x_spec = pl.BlockSpec((tm, tk), lambda j, i, k: (i, k))
    w_spec = pl.BlockSpec((tn, tk), lambda j, i, k: (j, k))
    b_spec = pl.BlockSpec((1, tn), lambda j, i, k: (0, j))
    y_spec = pl.BlockSpec((tm, tn), lambda j, i, k: (i, j))

    if quantiles is None:
        return pl.pallas_call(
            _linear_kernel,
            out_shape=jax.ShapeDtypeStruct((B, Fout), out_dtype),
            grid_spec=pltpu.PrefetchScalarGridSpec(
                num_scalar_prefetch=0,
                grid=grid,
                in_specs=[x_spec, w_spec, b_spec],
                out_specs=y_spec,
                scratch_shapes=[pltpu.VMEM((tm, tn), jnp.float32)]),
            compiler_params=pltpu.CompilerParams(
                dimension_semantics=("parallel", "parallel", "arbitrary"),
                vmem_limit_bytes=vmem_limit),
        )(x_bf, w_bf, b2)

    qin_spec = pl.BlockSpec((Q, tn), lambda j, i, k: (0, j))
    qout_spec = pl.BlockSpec((Q, tn), lambda j, i, k: (0, j))
    kernel = functools.partial(_linear_quantile_kernel, batch_size=B)
    return pl.pallas_call(
        kernel,
        out_shape=(jax.ShapeDtypeStruct((B, Fout), out_dtype),
                   jax.ShapeDtypeStruct((Q, Fout), jnp.float32)),
        grid_spec=pltpu.PrefetchScalarGridSpec(
            num_scalar_prefetch=0,
            grid=grid,
            in_specs=[x_spec, w_spec, b_spec, qin_spec],
            out_specs=[y_spec, qout_spec],
            scratch_shapes=[pltpu.VMEM((tm, tn), jnp.float32),
                            pltpu.VMEM((Q, tn), jnp.float32)]),
        compiler_params=pltpu.CompilerParams(
            # M axis is "arbitrary": the change accumulator persists across it.
            dimension_semantics=("parallel", "arbitrary", "arbitrary"),
            vmem_limit_bytes=vmem_limit),
    )(x_bf, w_bf, b2, quantiles.astype(jnp.float32))


# --------------------------------------------------------------------------
# LinearST functional forward (state carried explicitly, lane-dense (Q, Fout))
# --------------------------------------------------------------------------
def linear_st_forward(x, W, b, quantiles_qf, is_first_forward_pass, quantile_count):
    """Returns (y, new_quantiles). quantiles are (quantile_count, out_features)."""
    if is_first_forward_pass:
        y = linear_st_pallas(x, W, b)
        # TODO(synk): torch.quantile (sort + linear interpolation) has no clean
        # Pallas equivalent; one vectorized jnp.quantile over the batch axis
        # (single fused sort for all out_features) is used instead.
        probs = jnp.arange(1, quantile_count + 1, dtype=jnp.float32) / (quantile_count + 1.0)
        new_q = jnp.quantile(y, probs, axis=0).astype(jnp.float32)   # (Q, Fout)
        return y, new_q
    y, new_q = linear_st_pallas(x, W, b, quantiles_qf)
    return y, new_q


if __name__ == "__main__":
    key = jax.random.PRNGKey(0)
    kw, kb, kx1, kx2 = jax.random.split(key, 4)

    # Module hyper-parameters.  384 is deliberately NOT a multiple of 256/512:
    # the new tile selector now keeps it as a single full-dim (1,1,1) block
    # (it fits the VMEM budget) instead of a 27-step grid of 128 tiles.
    sim_queue_length = 16            # unused by forward, kept for parity
    quantile_count = 5
    in_features, out_features = 384, 384
    B = 384

    # Deterministic nn.Linear-style init: uniform(-1/sqrt(fan_in), 1/sqrt(fan_in))
    bound = 1.0 / (in_features ** 0.5)
    W = jax.random.uniform(kw, (out_features, in_features), jnp.float32, -bound, bound)
    b = jax.random.uniform(kb, (out_features,), jnp.float32, -bound, bound)
    # Quantile state carried lane-dense as (Q, out_features) (transpose of the
    # module's (out_features, Q) buffer; use .T to interop with the module layout).
    quantiles = jnp.zeros((quantile_count, out_features), jnp.float32)

    # Forward pass 1: first pass -> quantile initialization branch
    x1 = jax.random.normal(kx1, (B, in_features), jnp.float32)
    y1, quantiles = linear_st_forward(
        x1, W, b, quantiles, is_first_forward_pass=True, quantile_count=quantile_count
    )

    # Forward pass 2: fused linear + streaming quantile-update Pallas kernel
    x2 = jax.random.normal(kx2, (B, in_features), jnp.float32)
    y2, quantiles_new = linear_st_forward(
        x2, W, b, quantiles, is_first_forward_pass=False, quantile_count=quantile_count
    )

    jax.block_until_ready((y1, y2, quantiles_new))

    # Loose sanity check vs a pure-JAX f32 reference (kernel feeds the MXU bf16
    # operands, so tolerances are generous).
    y2_ref = x2 @ W.T + b
    assert float(jnp.max(jnp.abs(y2 - y2_ref))) < 0.1, "linear output mismatch"

    Q = quantile_count
    over = (y2_ref[:, None, :] >= quantiles[None, :, :]).astype(jnp.float32)  # (B, Q, F)
    k_idx = jnp.arange(Q, dtype=jnp.float32)[None, :, None]
    s = (quantiles[Q - 1] - quantiles[1]) / 10.0 / (Q + 2)
    change = over * (1.0 + k_idx) - (1.0 - over) * (Q - k_idx)
    change = change * (s[None, None, :] / (Q + 1))
    q_ref_new = quantiles + jnp.mean(change, axis=0)
    assert float(jnp.max(jnp.abs(quantiles_new - q_ref_new))) < 0.05, "quantile mismatch"

    print("KERNEL_OK")
</pallas_src>

<mosaic_0001>
module attributes {stable_mosaic.version = 11 : i64} {
  func.func @_linear_kernel(%arg0: i32, %arg1: i32, %arg2: i32, %arg3: memref<384x384xbf16, #tpu.memory_space<vmem>>, %arg4: memref<384x384xbf16, #tpu.memory_space<vmem>>, %arg5: memref<1x384xf32, #tpu.memory_space<vmem>>, %arg6: memref<384x384xf32, #tpu.memory_space<vmem>>, %arg7: memref<384x384xf32, #tpu.memory_space<vmem>>) attributes {dimension_semantics = [#tpu.dimension_semantics<parallel>, #tpu.dimension_semantics<parallel>, #tpu.dimension_semantics<arbitrary>], iteration_bounds = array<i64: 1, 1, 1>, scalar_prefetch = 0 : i64, scratch_operands = 1 : i64, tpu.core_type = #tpu.core_type<tc>, window_params = [{transform_indices = @transform_0, window_bounds = array<i64: 384, 384>}, {transform_indices = @transform_1, window_bounds = array<i64: 384, 384>}, {transform_indices = @transform_2, window_bounds = array<i64: 1, 384>}, {transform_indices = @transform_3, window_bounds = array<i64: 384, 384>}]} {
    %c0_i32 = arith.constant 0 : i32
    %0 = arith.cmpi eq, %arg2, %c0_i32 : i32
    %1 = arith.extui %0 : i1 to i32
    %c0_i32_0 = arith.constant 0 : i32
    %2 = arith.cmpi ne, %1, %c0_i32_0 : i32
    scf.if %2 {
      %cst_10 = arith.constant 0.000000e+00 : f32
      %12 = vector.broadcast %cst_10 : f32 to vector<384x384xf32>
      %c0_11 = arith.constant 0 : index
      %c0_12 = arith.constant 0 : index
      %13 = vector.load %arg7[%c0_11, %c0_12] : memref<384x384xf32, #tpu.memory_space<vmem>>, vector<384x384xf32>
      tpu.vector_store %arg7[%c0_11, %c0_12], %12 {strides = array<i32>} : memref<384x384xf32, #tpu.memory_space<vmem>>, vector<384x384xf32>,
    } else {
    }
    %c0 = arith.constant 0 : index
    %c0_1 = arith.constant 0 : index
    %3 = vector.load %arg7[%c0, %c0_1] : memref<384x384xf32, #tpu.memory_space<vmem>>, vector<384x384xf32>
    %c0_2 = arith.constant 0 : index
    %c0_3 = arith.constant 0 : index
    %4 = vector.load %arg3[%c0_2, %c0_3] : memref<384x384xbf16, #tpu.memory_space<vmem>>, vector<384x384xbf16>
    %c0_4 = arith.constant 0 : index
    %c0_5 = arith.constant 0 : index
    %5 = vector.load %arg4[%c0_4, %c0_5] : memref<384x384xbf16, #tpu.memory_space<vmem>>, vector<384x384xbf16>
    %cst = arith.constant dense<0.000000e+00> : vector<384x384xf32>
    %6 = tpu.matmul %4, %5, %cst {dimension_numbers = #tpu.dot_dimension_numbers<[1], [1], [0], [0], [0, 0, 1, 0], [], []>} : vector<384x384xbf16>, vector<384x384xbf16>, vector<384x384xf32> -> vector<384x384xf32>
    %7 = arith.addf %3, %6 : vector<384x384xf32>
    %c0_6 = arith.constant 0 : index
    %c0_7 = arith.constant 0 : index
    %8 = vector.load %arg7[%c0_6, %c0_7] : memref<384x384xf32, #tpu.memory_space<vmem>>, vector<384x384xf32>
    tpu.vector_store %arg7[%c0_6, %c0_7], %7 {strides = array<i32>} : memref<384x384xf32, #tpu.memory_space<vmem>>, vector<384x384xf32>,
    %c0_i32_8 = arith.constant 0 : i32
    %9 = arith.cmpi eq, %arg2, %c0_i32_8 : i32
    %10 = arith.extui %9 : i1 to i32
    %c0_i32_9 = arith.constant 0 : i32
    %11 = arith.cmpi ne, %10, %c0_i32_9 : i32
    scf.if %11 {
      %c0_10 = arith.constant 0 : index
      %c0_11 = arith.constant 0 : index
      %12 = vector.load %arg7[%c0_10, %c0_11] : memref<384x384xf32, #tpu.memory_space<vmem>>, vector<384x384xf32>
      %c0_12 = arith.constant 0 : index
      %c0_13 = arith.constant 0 : index
      %13 = vector.load %arg5[%c0_12, %c0_13] : memref<1x384xf32, #tpu.memory_space<vmem>>, vector<1x384xf32>
      %14 = vector.broadcast %13 : vector<1x384xf32> to vector<384x384xf32>
      %15 = arith.addf %12, %14 : vector<384x384xf32>
      %c0_14 = arith.constant 0 : index
      %c0_15 = arith.constant 0 : index
      %16 = vector.load %arg6[%c0_14, %c0_15] : memref<384x384xf32, #tpu.memory_space<vmem>>, vector<384x384xf32>
      tpu.vector_store %arg6[%c0_14, %c0_15], %15 {strides = array<i32>} : memref<384x384xf32, #tpu.memory_space<vmem>>, vector<384x384xf32>,
    } else {
    }
    return
  }
  func.func @transform_0(%arg0: i32, %arg1: i32, %arg2: i32) -> (i32, i32) {
    %c0_i32 = arith.constant 0 : i32
    return %arg1, %arg2 : i32, i32
  }
  func.func @transform_1(%arg0: i32, %arg1: i32, %arg2: i32) -> (i32, i32) {
    %c0_i32 = arith.constant 0 : i32
    return %arg0, %arg2 : i32, i32
  }
  func.func @transform_2(%arg0: i32, %arg1: i32, %arg2: i32) -> (i32, i32) {
    %c0_i32 = arith.constant 0 : i32
    %c0_i32_0 = arith.constant 0 : i32
    return %c0_i32, %arg0 : i32, i32
  }
  func.func @transform_3(%arg0: i32, %arg1: i32, %arg2: i32) -> (i32, i32) {
    %c0_i32 = arith.constant 0 : i32
    return %arg1, %arg0 : i32, i32
  }
}

</mosaic_0001>

<bundles_post_ra>
// kernel: tpu_custom_call.1
= control target key start
LH: loop header
LB: loop body
LE: loop exit
PB: predicated region body
PF: predicated region fallthrough
CT: control target
= control target key end

     0   :  { %8 = vsyncpa [#allocation4], 0  ;;  %s4477_s0 = inlined_call_operand.hbm [shape: bf16[384,384], index: 0, kind: input, shape index: {}]   ;;  %s4478_s1 = inlined_call_operand.hbm [shape: bf16[384,384], index: 1, kind: input, shape index: {}]   ;;  %s4479_s2 = inlined_call_operand.vmem [shape: f32[1,384], index: 2, kind: input, shape index: {}]   ;;  %s4480_s3 = inlined_call_operand.hbm [shape: f32[384,384], index: 3, kind: output, shape index: {}]  }
   0x1   :  { %9 = vsyncpa [#allocation7], 0 }
   0x2   :  { %10 = vsyncpa [#allocation5], 0  ;;  %s3620_s12 = smov [#allocation3]  }
   0x3   :  { %s16_s13 = sshll.u32 %s3620_s12, 4  ;;  %s17_s13 = int_to_ptr.vmem [resolvable:$true] %s16_s13 }
   0x4   :  { %s3562_s14 = scalar_lea.vmem %s17_s13, 9216  ;;  %p3567_p1 = scmp.lt.s32.totalorder %s17_s13, %s17_s13 }
   0x5   :  { %p3563_p0 = scmp.ne.s32.totalorder %s17_s13, %s3562_s14  ;;  %p3568_p2 = scmp.lt.s32.totalorder %s3562_s14, %s3562_s14 }
   0x7   :  { %p3569_p3 = por %p3568_p2, %p3567_p1 }
   0x9   :  { %p3570_p4 = pnand %p3569_p3, %p3563_p0 }
   0xb   :  { %3573 = shalt.err (!%p3570_p4)
}
   0xc   :  { %s3621_s15 = smov 192   ;;  %s3622_s16 = smov 12  }
   0xd   :  { %22 = dma.hbm_to_vmem [thread:$0]  %s4477_s0, 9216, %s17_s13, [#allocation4], %s3621_s15, %s3621_s15, %s3622_s16  }
   0xe   :  { %s3623_s19 = smov [#allocation6]  }
   0xf   :  { %s28_s20 = sshll.u32 %s3623_s19, 4  ;;  %s29_s20 = int_to_ptr.vmem [resolvable:$true] %s28_s20 }
  0x10   :  { %s3582_s21 = scalar_lea.vmem %s29_s20, 9216  ;;  %p3587_p6 = scmp.lt.s32.totalorder %s29_s20, %s29_s20 }
  0x11   :  { %p3583_p5 = scmp.ne.s32.totalorder %s29_s20, %s3582_s21  ;;  %p3588_p7 = scmp.lt.s32.totalorder %s3582_s21, %s3582_s21 }
  0x13   :  { %p3589_p8 = por %p3588_p7, %p3587_p6 }
  0x15   :  { %p3590_p9 = pnand %p3589_p8, %p3583_p5 }
  0x17   :  { %3593 = shalt.err (!%p3590_p9)
}
  0x18   :  { %34 = dma.hbm_to_vmem [thread:$0]  %s4478_s1, 9216, %s29_s20, [#allocation7], %s3621_s15, %s3621_s15, %s3622_s16  }
  0x19   :  { %3614 = dma.done.wait [#allocation4], 9216  }
  0x1a   :  { %3615 = vsyncadd [#allocation4], 4294958080 }
  0x1b   :  { %3616 = dma.done.wait [#allocation7], 9216  }
  0x1c   :  { %3617 = vsyncadd [#allocation7], 4294958080  ;;  %v3361_v0 = vld [vmem:[#allocation6 + $0xac] ss:$12 sps:$4 sm:$0xff]   ;;  %v3363_v1 = vld [vmem:[#allocation6 + $0x170] ss:$12 sps:$4 sm:$0xff]  }
  0x1d   :  { %1296 = vmatprep.subr.bf16.mxu0 %v3361_v0  ;;  %v3364_v2 = vld [vmem:[#allocation6 + $0xa8] ss:$12 sps:$4 sm:$0xff]   ;;  %3194 = vmatprep.subr.bf16.mxu1 %v3363_v1  ;;  %v3365_v3 = vld [vmem:[#allocation6 + $0xb0] ss:$12 sps:$4 sm:$0xff]   ;;  %v3368_v5 = vld [vmem:[#allocation6 + $0x158] ss:$12 sps:$4 sm:$0xff]  }
  0x1e   :  { %1297 = vmatpush1.bf16.xpose.msra.mxu0 %v3364_v2  ;;  %v3366_v4 = vld [vmem:[#allocation6 + $0x94] ss:$12 sps:$4 sm:$0xff]   ;;  %3195 = vmatpush3.bf16.xpose.msra.mxu1 %v3365_v3  ;;  %v3369_v6 = vld [vmem:[#allocation6 + $0x90] ss:$12 sps:$4 sm:$0xff]   ;;  %v3370_v7 = vld [vmem:[#allocation6 + $0x98] ss:$12 sps:$4 sm:$0xff]  }
  0x1f   :  { %1298 = vmatprep.subr.bf16.mxu0 %v3366_v4  ;;  %3196 = vmatprep.subr.bf16.mxu1 %v3368_v5  ;;  %v3371_v8 = vld [vmem:[#allocation6 + $0x7c] ss:$12 sps:$4 sm:$0xff]   ;;  %v3373_v9 = vld [vmem:[#allocation6 + $0x140] ss:$12 sps:$4 sm:$0xff]   ;;  %v3374_v10 = vld [vmem:[#allocation6 + $0x78] ss:$12 sps:$4 sm:$0xff]  }
  0x20   :  { %v3375_v11 = vld [vmem:[#allocation6 + $0x80] ss:$12 sps:$4 sm:$0xff]   ;;  %v3376_v12 = vld [vmem:[#allocation6 + $0x64] ss:$12 sps:$4 sm:$0xff]   ;;  %v3378_v13 = vld [vmem:[#allocation6 + $0x128] ss:$12 sps:$4 sm:$0xff]  }
  0x21   :  { %v3379_v14 = vld [vmem:[#allocation6 + $0x60] ss:$12 sps:$4 sm:$0xff]   ;;  %v3380_v15 = vld [vmem:[#allocation6 + $0x68] ss:$12 sps:$4 sm:$0xff]   ;;  %v3383_v17 = vld [vmem:[#allocation6 + $0x110] ss:$12 sps:$4 sm:$0xff]  }
  0x22   :  { %v3381_v16 = vld [vmem:[#allocation6 + $0x4c] ss:$12 sps:$4 sm:$0xff]   ;;  %v3653_v18 = vld [vmem:[#allocation3 + $0x8] ss:$12 sps:$4 sm:$0xff]   ;;  %v3385_v20 = vld [vmem:[#allocation6 + $0x50] ss:$12 sps:$4 sm:$0xff]  }
  0x23   :  { %3210 = vmatprep.mubr.bf16.mxu1 %v3653_v18  ;;  %v3384_v19 = vld [vmem:[#allocation6 + $0x48] ss:$12 sps:$4 sm:$0xff]   ;;  %v3388_v22 = vld [vmem:[#allocation6 + $0xf8] ss:$12 sps:$4 sm:$0xff]   ;;  %v3389_v23 = vld [vmem:[#allocation6 + $0x30] ss:$12 sps:$4 sm:$0xff]  }
  0x24   :  { %v3386_v21 = vld [vmem:[#allocation6 + $0x34] ss:$12 sps:$4 sm:$0xff]   ;;  %v3390_v24 = vld [vmem:[#allocation6 + $0x38] ss:$12 sps:$4 sm:$0xff]   ;;  %v3391_v25 = vld [vmem:[#allocation6 + $0x1c] ss:$12 sps:$4 sm:$0xff]  }
  0x25   :  { %v3393_v26 = vld [vmem:[#allocation6 + $0xe0] ss:$12 sps:$4 sm:$0xff]   ;;  %v3394_v27 = vld [vmem:[#allocation6 + $0x18] ss:$12 sps:$4 sm:$0xff]   ;;  %v3398_v30 = vld [vmem:[#allocation6 + $0xc8] ss:$12 sps:$4 sm:$0xff]  }
  0x26   :  { %1299 = vmatpush1.bf16.xpose.msra.mxu0 %v3369_v6  ;;  %3197 = vmatpush3.bf16.xpose.msra.mxu1 %v3370_v7  ;;  %v3395_v28 = vld [vmem:[#allocation6 + $0x20] ss:$12 sps:$4 sm:$0xff]   ;;  %v3396_v29 = vld [vmem:[#allocation6 + $0x4] ss:$12 sps:$4 sm:$0xff]   ;;  %v3400_v33 = vld [vmem:[#allocation6 + $0x8] ss:$12 sps:$4 sm:$0xff]  }
  0x27   :  { %1300 = vmatprep.subr.bf16.mxu0 %v3371_v8  ;;  %3198 = vmatprep.subr.bf16.mxu1 %v3373_v9  ;;  %v3656_v31 = vld [vmem:[#allocation3 + $0x4] ss:$12 sps:$4 sm:$0xff]   ;;  %v3399_v32 = vld [vmem:[#allocation6] ss:$12 sps:$4 sm:$0xff]   ;;  %v3404_v36 = vld [vmem:[#allocation6 + $0x228] ss:$12 sps:$4 sm:$0xff]  }
  0x28   :  { %1328 = vmatprep.mubr.bf16.mxu0 %v3656_v31  ;;  %v3402_v34 = vld [vmem:[#allocation6 + $0x16c] ss:$12 sps:$4 sm:$0xff]   ;;  %v3407_v37 = vld [vmem:[#allocation6 + $0x168] ss:$12 sps:$4 sm:$0xff]   ;;  %v3411_v41 = vld [vmem:[#allocation6 + $0x150] ss:$12 sps:$4 sm:$0xff]  }
  0x29   :  { %v3406_v35 = vld [vmem:[#allocation6 + $0x22c] ss:$12 sps:$4 sm:$0xff]   ;;  %v3409_v39 = vld [vmem:[#allocation6 + $0x154] ss:$12 sps:$4 sm:$0xff]   ;;  %v3413_v43 = vld [vmem:[#allocation6 + $0x13c] ss:$12 sps:$4 sm:$0xff]  }
  0x2a   :  { %v3659_v38 = vld [vmem:[#allocation3 + $0x20] ss:$12 sps:$4 sm:$0xff]   ;;  %v3663_v42 = vld [vmem:[#allocation3 + $0x38] ss:$12 sps:$4 sm:$0xff]   ;;  %v3419_v44 = vld [vmem:[#allocation6 + $0x210] ss:$12 sps:$4 sm:$0xff]  }
  0x2b   :  { %v3421_v40 = vld [vmem:[#allocation6 + $0x214] ss:$12 sps:$4 sm:$0xff]   ;;  %v3436_v45 = vld [vmem:[#allocation6 + $0x1fc] ss:$12 sps:$4 sm:$0xff]   ;;  %v3415_v46 = vld [vmem:[#allocation6 + $0x138] ss:$12 sps:$4 sm:$0xff]  }
  0x2c   :  { %v3667_v47 = vld [vmem:[#allocation3 + $0x50] ss:$12 sps:$4 sm:$0xff]   ;;  %v3434_v49 = vld [vmem:[#allocation6 + $0x1f8] ss:$12 sps:$4 sm:$0xff]   ;;  %v3422_v51 = vld [vmem:[#allocation6 + $0x120] ss:$12 sps:$4 sm:$0xff]  }
  0x2d   :  { %v3417_v48 = vld [vmem:[#allocation6 + $0x124] ss:$12 sps:$4 sm:$0xff]   ;;  %v3671_v52 = vld [vmem:[#allocation3 + $0x68] ss:$12 sps:$4 sm:$0xff]   ;;  %v3424_v53 = vld [vmem:[#allocation6 + $0x10c] ss:$12 sps:$4 sm:$0xff]  }
  0x2e   :  { %1301 = vmatpush1.bf16.xpose.msra.mxu0 %v3374_v10  ;;  %3199 = vmatpush3.bf16.xpose.msra.mxu1 %v3375_v11  ;;  %v3452_v50 = vld [vmem:[#allocation6 + $0x1e4] ss:$12 sps:$4 sm:$0xff]   ;;  %v3450_v54 = vld [vmem:[#allocation6 + $0x1e0] ss:$12 sps:$4 sm:$0xff]   ;;  %v3426_v56 = vld [vmem:[#allocation6 + $0x108] ss:$12 sps:$4 sm:$0xff]  }
  0x2f   :  { %1302 = vmatprep.subr.bf16.mxu0 %v3376_v12  ;;  %3200 = vmatprep.subr.bf16.mxu1 %v3378_v13  ;;  %v3468_v55 = vld [vmem:[#allocation6 + $0x1cc] ss:$12 sps:$4 sm:$0xff]   ;;  %v3428_v58 = vld [vmem:[#allocation6 + $0xf4] ss:$12 sps:$4 sm:$0xff]   ;;  %v3430_v61 = vld [vmem:[#allocation6 + $0xf0] ss:$12 sps:$4 sm:$0xff]  }
  0x30   :  { %v3675_v57 = vld [vmem:[#allocation3 + $0x80] ss:$12 sps:$4 sm:$0xff]   ;;  %v3466_v59 = vld [vmem:[#allocation6 + $0x1c8] ss:$12 sps:$4 sm:$0xff]   ;;  %v3679_v62 = vld [vmem:[#allocation3 + $0x98] ss:$12 sps:$4 sm:$0xff]  }
  0x31   :  { %v3484_v60 = vld [vmem:[#allocation6 + $0x1b4] ss:$12 sps:$4 sm:$0xff]   ;;  %v3432_v63 = vld [vmem:[#allocation6 + $0xdc] ss:$12 sps:$4 sm:$0xff]   ;;  %v3437_v2 = vld [vmem:[#allocation6 + $0xd8] ss:$12 sps:$4 sm:$0xff]  }
  0x32   :  { %v3482_v0 = vld [vmem:[#allocation6 + $0x1b0] ss:$12 sps:$4 sm:$0xff]   ;;  %v3498_v5 = vld [vmem:[#allocation6 + $0x198] ss:$12 sps:$4 sm:$0xff]   ;;  %v3441_v7 = vld [vmem:[#allocation6 + $0xc0] ss:$12 sps:$4 sm:$0xff]  }
  0x33   :  { %v3500_v1 = vld [vmem:[#allocation6 + $0x19c] ss:$12 sps:$4 sm:$0xff]   ;;  %v3439_v4 = vld [vmem:[#allocation6 + $0xc4] ss:$12 sps:$4 sm:$0xff]   ;;  %v3514_v10 = vld [vmem:[#allocation6 + $0x180] ss:$12 sps:$4 sm:$0xff]  }
  0x34   :  { %v3683_v3 = vld [vmem:[#allocation3 + $0xb0] ss:$12 sps:$4 sm:$0xff]   ;;  %v3687_v8 = vld [vmem:[#allocation3 + $0xc8] ss:$12 sps:$4 sm:$0xff]   ;;  %v3691_v11 = vld [vmem:[#allocation3] ss:$12 sps:$4 sm:$0xff]  }
  0x35   :  { %v3516_v6 = vld [vmem:[#allocation6 + $0x184] ss:$12 sps:$4 sm:$0xff]   ;;  %v3693_v12 = vld [vmem:[#allocation3 + $0x1c] ss:$12 sps:$4 sm:$0xff]   ;;  %v3695_v13 = vld [vmem:[#allocation3 + $0xe0] ss:$12 sps:$4 sm:$0xff]  }
  0x36   :  { %1303 = vmatpush1.bf16.xpose.msra.mxu0 %v3379_v14  ;;  %3201 = vmatpush3.bf16.xpose.msra.mxu1 %v3380_v15  ;;  %v3461_v9 = vld [vmem:[#allocation6 + $0x230] ss:$12 sps:$4 sm:$0xff]   ;;  %v3477_v14 = vld [vmem:[#allocation6 + $0x218] ss:$12 sps:$4 sm:$0xff]  }
  0x37   :  { %1304 = vmatprep.subr.bf16.mxu0 %v3381_v16  ;;  %3202 = vmatprep.subr.bf16.mxu1 %v3383_v17  ;;  %v3701_v15 = vld [vmem:[#allocation3 + $0x18] ss:$12 sps:$4 sm:$0xff]   ;;  %v3703_v16 = vld [vmem:[#allocation3 + $0x34] ss:$12 sps:$4 sm:$0xff]  }
  0x38   :  { %v3705_v17 = vld [vmem:[#allocation3 + $0xf8] ss:$12 sps:$4 sm:$0xff]  }
  0x3e   :  { %1305 = vmatpush1.bf16.xpose.msra.mxu0 %v3384_v19  ;;  %3203 = vmatpush3.bf16.xpose.msra.mxu1 %v3385_v20  ;;  %v3493_v19 = vld [vmem:[#allocation6 + $0x200] ss:$12 sps:$4 sm:$0xff]   ;;  %v3711_v20 = vld [vmem:[#allocation3 + $0x30] ss:$12 sps:$4 sm:$0xff]  }
  0x3f   :  { %1306 = vmatprep.subr.bf16.mxu0 %v3386_v21  ;;  %3204 = vmatprep.subr.bf16.mxu1 %v3388_v22  ;;  %v3713_v21 = vld [vmem:[#allocation3 + $0x4c] ss:$12 sps:$4 sm:$0xff]   ;;  %v3715_v22 = vld [vmem:[#allocation3 + $0x110] ss:$12 sps:$4 sm:$0xff]  }
  0x46   :  { %1307 = vmatpush1.bf16.xpose.msra.mxu0 %v3389_v23  ;;  %3205 = vmatpush3.bf16.xpose.msra.mxu1 %v3390_v24  ;;  %v3509_v23 = vld [vmem:[#allocation6 + $0x1e8] ss:$12 sps:$4 sm:$0xff]  }
  0x47   :  { %1308 = vmatprep.subr.bf16.mxu0 %v3391_v25  ;;  %3206 = vmatprep.subr.bf16.mxu1 %v3393_v26  ;;  %v3721_v24 = vld [vmem:[#allocation3 + $0x48] ss:$12 sps:$4 sm:$0xff]   ;;  %v3723_v25 = vld [vmem:[#allocation3 + $0x64] ss:$12 sps:$4 sm:$0xff]  }
  0x48   :  { %v3725_v26 = vld [vmem:[#allocation3 + $0x128] ss:$12 sps:$4 sm:$0xff]  }
  0x4e   :  { %1309 = vmatpush1.bf16.xpose.msra.mxu0 %v3394_v27  ;;  %3207 = vmatpush3.bf16.xpose.msra.mxu1 %v3395_v28  ;;  %v3525_v27 = vld [vmem:[#allocation6 + $0x1d0] ss:$12 sps:$4 sm:$0xff]   ;;  %v3731_v28 = vld [vmem:[#allocation3 + $0x60] ss:$12 sps:$4 sm:$0xff]  }
  0x4f   :  { %1310 = vmatprep.subr.bf16.mxu0 %v3396_v29  ;;  %3208 = vmatprep.subr.bf16.mxu1 %v3398_v30  ;;  %v3733_v29 = vld [vmem:[#allocation3 + $0x7c] ss:$12 sps:$4 sm:$0xff]   ;;  %v3735_v30 = vld [vmem:[#allocation3 + $0x140] ss:$12 sps:$4 sm:$0xff]  }
  0x56   :  { %1311 = vmatpush1.bf16.xpose.msra.mxu0 %v3399_v32  ;;  %3209 = vmatpush3.bf16.xpose.msra.mxu1 %v3400_v33  ;;  %v3535_v32 = vld [vmem:[#allocation6 + $0x1b8] ss:$12 sps:$4 sm:$0xff]  }
  0x57   :  { %1312 = vmatprep.subr.bf16.mxu0 %v3402_v34  ;;  %1842 = vmatprep.subr.bf16.mxu1 %v3406_v35  ;;  %v3741_v33 = vld [vmem:[#allocation3 + $0x78] ss:$12 sps:$4 sm:$0xff]   ;;  %v3743_v34 = vld [vmem:[#allocation3 + $0x94] ss:$12 sps:$4 sm:$0xff]  }
  0x58   :  { %v3745_v35 = vld [vmem:[#allocation3 + $0x158] ss:$12 sps:$4 sm:$0xff]  }
  0x59   :  { %4510 = vst [vmem:[#allocation12_spill] sm:$0xff] %v3745_v35 }
  0x5d   :  { %3211 = vmatmul.mubr.bf16.vlgmr.msra.gmra.mxu1 %v3653_v18 }
  0x5e   :  { %1313 = vmatpush2.bf16.xpose.msra.mxu0 %v3407_v37  ;;  %1843 = vmatpush1.bf16.xpose.msra.mxu1 %v3404_v36  ;;  %v3751_v36 = vld [vmem:[#allocation3 + $0x90] ss:$12 sps:$4 sm:$0xff]   ;;  %v3753_v37 = vld [vmem:[#allocation3 + $0xac] ss:$12 sps:$4 sm:$0xff]  }
  0x5f   :  { %3212 = vmatprep.mubr.bf16.mxu1 %v3659_v38  ;;  %1314 = vmatprep.subr.bf16.mxu0 %v3409_v39  ;;  %v3755_v39 = vld [vmem:[#allocation3 + $0x170] ss:$12 sps:$4 sm:$0xff]  }
  0x60   :  { %1844 = vmatprep.subr.bf16.mxu1 %v3421_v40  ;;  %4511 = vst [vmem:[#allocation13_spill] sm:$0xff] %v3755_v39  ;;  %v3545_v40 = vld [vmem:[#allocation6 + $0x1a0] ss:$12 sps:$4 sm:$0xff]  }
  0x65   :  { %3213 = vmatmul.mubr.bf16.gmra.mxu1 %v3659_v38 }
  0x66   :  { %1315 = vmatpush2.bf16.xpose.msra.mxu0 %v3411_v41  ;;  %3214 = vmatprep.mubr.bf16.mxu1 %v3663_v42  ;;  %v3761_v41 = vld [vmem:[#allocation3 + $0xa8] ss:$12 sps:$4 sm:$0xff]  }
  0x67   :  { %1316 = vmatprep.subr.bf16.mxu0 %v3413_v43  ;;  %1845 = vmatpush1.bf16.xpose.msra.mxu1 %v3419_v44  ;;  %v3763_v43 = vld [vmem:[#allocation3 + $0xc4] ss:$12 sps:$4 sm:$0xff]   ;;  %v3765_v44 = vld [vmem:[#allocation3 + $0x188] ss:$12 sps:$4 sm:$0xff]  }
  0x68   :  { %1846 = vmatprep.subr.bf16.mxu1 %v3436_v45  ;;  %4512 = vst [vmem:[#allocation14_spill] sm:$0xff] %v3765_v44  ;;  %v3552_v45 = vld [vmem:[#allocation6 + $0x188] ss:$12 sps:$4 sm:$0xff]  }
  0x6d   :  { %3215 = vmatmul.mubr.bf16.gmra.mxu1 %v3663_v42 }
  0x6e   :  { %1317 = vmatpush2.bf16.xpose.msra.mxu0 %v3415_v46  ;;  %3216 = vmatprep.mubr.bf16.mxu1 %v3667_v47  ;;  %v3771_v46 = vld [vmem:[#allocation3 + $0xc0] ss:$12 sps:$4 sm:$0xff]  }
  0x6f   :  { %1318 = vmatprep.subr.bf16.mxu0 %v3417_v48  ;;  %1847 = vmatpush1.bf16.xpose.msra.mxu1 %v3434_v49  ;;  %v3773_v48 = vld [vmem:[#allocation3 + $0xdc] ss:$12 sps:$4 sm:$0xff]   ;;  %v3775_v49 = vld [vmem:[#allocation3 + $0x1a0] ss:$12 sps:$4 sm:$0xff]  }
  0x70   :  { %1848 = vmatprep.subr.bf16.mxu1 %v3452_v50  ;;  %4513 = vst [vmem:[#allocation15_spill] sm:$0xff] %v3775_v49  ;;  %v3781_v50 = vld [vmem:[#allocation3 + $0xd8] ss:$12 sps:$4 sm:$0xff]  }
  0x75   :  { %3217 = vmatmul.mubr.bf16.gmra.mxu1 %v3667_v47 }
  0x76   :  { %1319 = vmatpush2.bf16.xpose.msra.mxu0 %v3422_v51  ;;  %3218 = vmatprep.mubr.bf16.mxu1 %v3671_v52  ;;  %v3783_v51 = vld [vmem:[#allocation3 + $0xf4] ss:$12 sps:$4 sm:$0xff]  }
  0x77   :  { %1320 = vmatprep.subr.bf16.mxu0 %v3424_v53  ;;  %1849 = vmatpush1.bf16.xpose.msra.mxu1 %v3450_v54  ;;  %v3785_v53 = vld [vmem:[#allocation3 + $0x1b8] ss:$12 sps:$4 sm:$0xff]   ;;  %v3791_v54 = vld [vmem:[#allocation3 + $0xf0] ss:$12 sps:$4 sm:$0xff]  }
  0x78   :  { %1850 = vmatprep.subr.bf16.mxu1 %v3468_v55  ;;  %4514 = vst [vmem:[#allocation16_spill] sm:$0xff] %v3785_v53  ;;  %v3793_v55 = vld [vmem:[#allocation3 + $0x10c] ss:$12 sps:$4 sm:$0xff]  }
  0x7d   :  { %3219 = vmatmul.mubr.bf16.gmra.mxu1 %v3671_v52 }
  0x7e   :  { %1321 = vmatpush2.bf16.xpose.msra.mxu0 %v3426_v56  ;;  %3220 = vmatprep.mubr.bf16.mxu1 %v3675_v57  ;;  %v3795_v56 = vld [vmem:[#allocation3 + $0x1d0] ss:$12 sps:$4 sm:$0xff]  }
  0x7f   :  { %1322 = vmatprep.subr.bf16.mxu0 %v3428_v58  ;;  %1851 = vmatpush1.bf16.xpose.msra.mxu1 %v3466_v59  ;;  %4515 = vst [vmem:[#allocation17_spill] sm:$0xff] %v3795_v56  ;;  %v3801_v58 = vld [vmem:[#allocation3 + $0x108] ss:$12 sps:$4 sm:$0xff]   ;;  %v3803_v59 = vld [vmem:[#allocation3 + $0x124] ss:$12 sps:$4 sm:$0xff]  }
  0x80   :  { %1852 = vmatprep.subr.bf16.mxu1 %v3484_v60  ;;  %v3805_v60 = vld [vmem:[#allocation3 + $0x1e8] ss:$12 sps:$4 sm:$0xff]  }
  0x81   :  { %4516 = vst [vmem:[#allocation18_spill] sm:$0xff] %v3805_v60 }
  0x85   :  { %3221 = vmatmul.mubr.bf16.gmra.mxu1 %v3675_v57 }
  0x86   :  { %1323 = vmatpush2.bf16.xpose.msra.mxu0 %v3430_v61  ;;  %3222 = vmatprep.mubr.bf16.mxu1 %v3679_v62  ;;  %v3811_v61 = vld [vmem:[#allocation3 + $0x120] ss:$12 sps:$4 sm:$0xff]  }
  0x87   :  { %1324 = vmatprep.subr.bf16.mxu0 %v3432_v63  ;;  %1853 = vmatpush1.bf16.xpose.msra.mxu1 %v3482_v0  ;;  %v3813_v63 = vld [vmem:[#allocation3 + $0x13c] ss:$12 sps:$4 sm:$0xff]   ;;  %v3815_v0 = vld [vmem:[#allocation3 + $0x200] ss:$12 sps:$4 sm:$0xff]  }
  0x88   :  { %1854 = vmatprep.subr.bf16.mxu1 %v3500_v1  ;;  %4517 = vst [vmem:[#allocation19_spill] sm:$0xff] %v3815_v0  ;;  %v3821_v1 = vld [vmem:[#allocation3 + $0x138] ss:$12 sps:$4 sm:$0xff]  }
  0x8d   :  { %3223 = vmatmul.mubr.bf16.gmra.mxu1 %v3679_v62 }
  0x8e   :  { %1325 = vmatpush2.bf16.xpose.msra.mxu0 %v3437_v2  ;;  %3224 = vmatprep.mubr.bf16.mxu1 %v3683_v3  ;;  %v3823_v2 = vld [vmem:[#allocation3 + $0x154] ss:$12 sps:$4 sm:$0xff]  }
  0x8f   :  { %1326 = vmatprep.subr.bf16.mxu0 %v3439_v4  ;;  %1855 = vmatpush1.bf16.xpose.msra.mxu1 %v3498_v5  ;;  %v3825_v4 = vld [vmem:[#allocation3 + $0x218] ss:$12 sps:$4 sm:$0xff]   ;;  %v3831_v5 = vld [vmem:[#allocation3 + $0x150] ss:$12 sps:$4 sm:$0xff]  }
  0x90   :  { %1856 = vmatprep.subr.bf16.mxu1 %v3516_v6  ;;  %4518 = vst [vmem:[#allocation20_spill] sm:$0xff] %v3825_v4  ;;  %v3833_v6 = vld [vmem:[#allocation3 + $0x16c] ss:$12 sps:$4 sm:$0xff]  }
  0x91   :  { %4519 = vst [vmem:[#allocation21_spill] sm:$0xff] %v3833_v6 }
  0x95   :  { %3225 = vmatmul.mubr.bf16.gmra.mxu1 %v3683_v3 }
  0x96   :  { %1327 = vmatpush2.bf16.xpose.msra.mxu0 %v3441_v7  ;;  %3226 = vmatprep.mubr.bf16.mxu1 %v3687_v8  ;;  %v3835_v7 = vld [vmem:[#allocation3 + $0x230] ss:$12 sps:$4 sm:$0xff]  }
  0x97   :  { %3290 = vmatprep.subr.bf16.mxu0 %v3461_v9  ;;  %1857 = vmatpush1.bf16.xpose.msra.mxu1 %v3514_v10  ;;  %4520 = vst [vmem:[#allocation22_spill] sm:$0xff] %v3835_v7  ;;  %v3843_v10 = vld [vmem:[#allocation3 + $0x184] ss:$12 sps:$4 sm:$0xff]  }
  0x98   :  { %4522 = vst [vmem:[#allocation24_spill] sm:$0xff] %v3843_v10 }
  0x9d   :  { %1329 = vmatmul.mubr.bf16.vlgmr.msra.gmra.mxu0 %v3691_v11  ;;  %3227 = vmatmul.mubr.bf16.gmra.mxu1 %v3687_v8 }
  0x9e   :  { %1338 = vmatprep.mubr.bf16.mxu0 %v3693_v12  ;;  %3228 = vmatprep.mubr.bf16.mxu1 %v3695_v13 }
  0x9f   :  { %3291 = vmatpush3.bf16.xpose.msra.mxu0 %v3461_v9  ;;  %v3841_v9 = vld [vmem:[#allocation3 + $0x168] ss:$12 sps:$4 sm:$0xff]  }
  0xa0   :  { %3292 = vmatprep.subr.bf16.mxu0 %v3477_v14  ;;  %4521 = vst [vmem:[#allocation23_spill] sm:$0xff] %v3841_v9 }
  0xa5   :  { %1339 = vmatmul.mubr.bf16.gmra.mxu0 %v3701_v15  ;;  %3229 = vmatmul.mubr.bf16.gmra.mxu1 %v3695_v13 }
  0xa6   :  { %1348 = vmatprep.mubr.bf16.mxu0 %v3703_v16  ;;  %3230 = vmatprep.mubr.bf16.mxu1 %v3705_v17 }
  0xa7   :  { %3293 = vmatpush3.bf16.xpose.msra.mxu0 %v3477_v14  ;;  %v3849_v14 = vld [vmem:[#allocation3 + $0x180] ss:$12 sps:$4 sm:$0xff]  }
  0xa8   :  { %3294 = vmatprep.subr.bf16.mxu0 %v3493_v19  ;;  %4523 = vst [vmem:[#allocation25_spill] sm:$0xff] %v3849_v14 }
  0xad   :  { %1349 = vmatmul.mubr.bf16.gmra.mxu0 %v3711_v20  ;;  %3231 = vmatmul.mubr.bf16.gmra.mxu1 %v3705_v17 }
  0xae   :  { %1358 = vmatprep.mubr.bf16.mxu0 %v3713_v21  ;;  %3232 = vmatprep.mubr.bf16.mxu1 %v3715_v22 }
  0xaf   :  { %3295 = vmatpush3.bf16.xpose.msra.mxu0 %v3493_v19  ;;  %v3851_v19 = vld [vmem:[#allocation3 + $0x19c] ss:$12 sps:$4 sm:$0xff]  }
  0xb0   :  { %3296 = vmatprep.subr.bf16.mxu0 %v3509_v23  ;;  %4524 = vst [vmem:[#allocation26_spill] sm:$0xff] %v3851_v19 }
  0xb5   :  { %1359 = vmatmul.mubr.bf16.gmra.mxu0 %v3721_v24  ;;  %3233 = vmatmul.mubr.bf16.gmra.mxu1 %v3715_v22 }
  0xb6   :  { %1368 = vmatprep.mubr.bf16.mxu0 %v3723_v25  ;;  %3234 = vmatprep.mubr.bf16.mxu1 %v3725_v26 }
  0xb7   :  { %3297 = vmatpush3.bf16.xpose.msra.mxu0 %v3509_v23 }
  0xb8   :  { %3298 = vmatprep.subr.bf16.mxu0 %v3525_v27 }
  0xbd   :  { %1369 = vmatmul.mubr.bf16.gmra.mxu0 %v3731_v28  ;;  %3235 = vmatmul.mubr.bf16.gmra.mxu1 %v3725_v26 }
  0xbe   :  { %1378 = vmatprep.mubr.bf16.mxu0 %v3733_v29  ;;  %3236 = vmatprep.mubr.bf16.mxu1 %v3735_v30 }
  0xbf   :  { %3299 = vmatpush3.bf16.xpose.msra.mxu0 %v3525_v27 }
  0xc0   :  { %3300 = vmatprep.subr.bf16.mxu0 %v3535_v32 }
  0xc5   :  { %1379 = vmatmul.mubr.bf16.gmra.mxu0 %v3741_v33  ;;  %3237 = vmatmul.mubr.bf16.gmra.mxu1 %v3735_v30 }
  0xc6   :  { %1388 = vmatprep.mubr.bf16.mxu0 %v3743_v34  ;;  %3238 = vmatprep.mubr.bf16.mxu1 %v3745_v35 }
  0xc7   :  { %3301 = vmatpush3.bf16.xpose.msra.mxu0 %v3535_v32  ;;  %v3861_v32 = vld [vmem:[#allocation3 + $0x198] ss:$12 sps:$4 sm:$0xff]  }
  0xc8   :  { %3302 = vmatprep.subr.bf16.mxu0 %v3545_v40  ;;  %4525 = vst [vmem:[#allocation27_spill] sm:$0xff] %v3861_v32 }
  0xcd   :  { %1389 = vmatmul.mubr.bf16.gmra.mxu0 %v3751_v36  ;;  %3239 = vmatmul.mubr.bf16.gmra.mxu1 %v3745_v35 }
  0xce   :  { %1398 = vmatprep.mubr.bf16.mxu0 %v3753_v37  ;;  %3240 = vmatprep.mubr.bf16.mxu1 %v3755_v39 }
  0xcf   :  { %3303 = vmatpush3.bf16.xpose.msra.mxu0 %v3545_v40 }
  0xd0   :  { %3304 = vmatprep.subr.bf16.mxu0 %v3552_v45 }
  0xd5   :  { %1399 = vmatmul.mubr.bf16.gmra.mxu0 %v3761_v41  ;;  %3241 = vmatmul.mubr.bf16.gmra.mxu1 %v3755_v39 }
  0xd6   :  { %1408 = vmatprep.mubr.bf16.mxu0 %v3763_v43  ;;  %3242 = vmatprep.mubr.bf16.mxu1 %v3765_v44 }
  0xd7   :  { %3305 = vmatpush3.bf16.xpose.msra.mxu0 %v3552_v45 }
  0xdd   :  { %1409 = vmatmul.mubr.bf16.gmra.mxu0 %v3771_v46  ;;  %3243 = vmatmul.mubr.bf16.gmra.mxu1 %v3765_v44  ;;  %v3945_v44 = vld [vmem:[#allocation3 + $0x22c] ss:$12 sps:$4 sm:$0xff]  }
  0xde   :  { %1418 = vmatprep.mubr.bf16.mxu0 %v3773_v48  ;;  %3244 = vmatprep.mubr.bf16.mxu1 %v3775_v49  ;;  %4536 = vst [vmem:[#allocation38_spill] sm:$0xff] %v3945_v44 }
  0xe5   :  { %1419 = vmatmul.mubr.bf16.gmra.mxu0 %v3781_v50  ;;  %3245 = vmatmul.mubr.bf16.gmra.mxu1 %v3775_v49  ;;  %v3929_v49 = vld [vmem:[#allocation3 + $0x214] ss:$12 sps:$4 sm:$0xff]  }
  0xe6   :  { %1428 = vmatprep.mubr.bf16.mxu0 %v3783_v51  ;;  %3246 = vmatprep.mubr.bf16.mxu1 %v3785_v53  ;;  %4534 = vst [vmem:[#allocation36_spill] sm:$0xff] %v3929_v49 }
  0xed   :  { %1429 = vmatmul.mubr.bf16.gmra.mxu0 %v3791_v54  ;;  %3247 = vmatmul.mubr.bf16.gmra.mxu1 %v3785_v53  ;;  %v3913_v53 = vld [vmem:[#allocation3 + $0x1fc] ss:$12 sps:$4 sm:$0xff]  }
  0xee   :  { %1438 = vmatprep.mubr.bf16.mxu0 %v3793_v55  ;;  %3248 = vmatprep.mubr.bf16.mxu1 %v3795_v56  ;;  %4532 = vst [vmem:[#allocation34_spill] sm:$0xff] %v3913_v53 }
  0xf5   :  { %1439 = vmatmul.mubr.bf16.gmra.mxu0 %v3801_v58  ;;  %3249 = vmatmul.mubr.bf16.gmra.mxu1 %v3795_v56  ;;  %v3897_v56 = vld [vmem:[#allocation3 + $0x1e4] ss:$12 sps:$4 sm:$0xff]  }
  0xf6   :  { %1448 = vmatprep.mubr.bf16.mxu0 %v3803_v59  ;;  %3250 = vmatprep.mubr.bf16.mxu1 %v3805_v60  ;;  %4530 = vst [vmem:[#allocation32_spill] sm:$0xff] %v3897_v56 }
  0xfd   :  { %1449 = vmatmul.mubr.bf16.gmra.mxu0 %v3811_v61  ;;  %3251 = vmatmul.mubr.bf16.gmra.mxu1 %v3805_v60 }
  0xfe   :  { %1458 = vmatprep.mubr.bf16.mxu0 %v3813_v63  ;;  %3252 = vmatprep.mubr.bf16.mxu1 %v3815_v0 }
 0x105   :  { %1459 = vmatmul.mubr.bf16.gmra.mxu0 %v3821_v1  ;;  %3253 = vmatmul.mubr.bf16.gmra.mxu1 %v3815_v0  ;;  %v3881_v0 = vld [vmem:[#allocation3 + $0x1cc] ss:$12 sps:$4 sm:$0xff]  }
 0x106   :  { %1468 = vmatprep.mubr.bf16.mxu0 %v3823_v2  ;;  %3254 = vmatprep.mubr.bf16.mxu1 %v3825_v4  ;;  %4528 = vst [vmem:[#allocation30_spill] sm:$0xff] %v3881_v0 }
 0x10d   :  { %1469 = vmatmul.mubr.bf16.gmra.mxu0 %v3831_v5  ;;  %3255 = vmatmul.mubr.bf16.gmra.mxu1 %v3825_v4 }
 0x10e   :  { %1478 = vmatprep.mubr.bf16.mxu0 %v3833_v6  ;;  %3256 = vmatprep.mubr.bf16.mxu1 %v3835_v7 }
 0x115   :  { %1479 = vmatmul.mubr.bf16.gmra.mxu0 %v3841_v9  ;;  %3257 = vmatmul.mubr.bf16.gmra.mxu1 %v3835_v7 }
 0x116   :  { %1488 = vmatprep.mubr.bf16.mxu0 %v3843_v10  ;;  %1874 = vmatprep.mubr.bf16.mxu1 %v3656_v31  ;;  %v3865_v31 = vld [vmem:[#allocation3 + $0x1b4] ss:$12 sps:$4 sm:$0xff]  }
 0x117   :  { %4526 = vst [vmem:[#allocation28_spill] sm:$0xff] %v3865_v31 }
 0x11d   :  { %1489 = vmatmul.mubr.bf16.gmra.mxu0 %v3849_v14  ;;  %v3854_v23 = vpop.f32.mrf.mxu1  ;;  %1875 = vmatmul.mubr.bf16.vlgmr.msra.gmra.mxu1 %v3691_v11 }
 0x11e   :  { %1498 = vmatprep.mubr.bf16.mxu0 %v3851_v19  ;;  %1882 = vmatprep.mubr.bf16.mxu1 %v3693_v12  ;;  %v3877_v12 = vld [vmem:[#allocation3 + $0x1b0] ss:$12 sps:$4 sm:$0xff]  }
 0x11f   :  { %v3859_v27 = vpop.f32.mrf.mxu1  ;;  %4527 = vst [vmem:[#allocation29_spill] sm:$0xff] %v3877_v12 }
 0x121   :  { %v3863_v40 = vpop.f32.mrf.mxu1 }
 0x123   :  { %v3867_v45 = vpop.f32.mrf.mxu1 }
 0x125   :  { %1499 = vmatmul.mubr.bf16.gmra.mxu0 %v3861_v32  ;;  %v3870_v7 = vpop.f32.mrf.mxu1  ;;  %1883 = vmatmul.mubr.bf16.gmra.mxu1 %v3701_v15 }
 0x126   :  { %1508 = vmatprep.mubr.bf16.mxu0 %v3865_v31  ;;  %1890 = vmatprep.mubr.bf16.mxu1 %v3703_v16  ;;  %v3893_v16 = vld [vmem:[#allocation3 + $0x1c8] ss:$12 sps:$4 sm:$0xff]  }
 0x127   :  { %v3875_v11 = vpop.f32.mrf.mxu1  ;;  %4529 = vst [vmem:[#allocation31_spill] sm:$0xff] %v3893_v16 }
 0x129   :  { %v3879_v4 = vpop.f32.mrf.mxu1 }
 0x12b   :  { %v3883_v60 = vpop.f32.mrf.mxu1 }
 0x12d   :  { %1509 = vmatmul.mubr.bf16.gmra.mxu0 %v3877_v12  ;;  %v3886_v32 = vpop.f32.mrf.mxu1  ;;  %1891 = vmatmul.mubr.bf16.gmra.mxu1 %v3711_v20 }
 0x12e   :  { %1518 = vmatprep.mubr.bf16.mxu0 %v3881_v0  ;;  %1898 = vmatprep.mubr.bf16.mxu1 %v3713_v21  ;;  %v3909_v21 = vld [vmem:[#allocation3 + $0x1e0] ss:$12 sps:$4 sm:$0xff]  }
 0x12f   :  { %v3891_v15 = vpop.f32.mrf.mxu1  ;;  %4531 = vst [vmem:[#allocation33_spill] sm:$0xff] %v3909_v21 }
 0x131   :  { %v3895_v31 = vpop.f32.mrf.mxu1 }
 0x133   :  { %v3899_v19 = vpop.f32.mrf.mxu1 }
 0x135   :  { %1519 = vmatmul.mubr.bf16.gmra.mxu0 %v3893_v16  ;;  %v3902_v12 = vpop.f32.mrf.mxu1  ;;  %1899 = vmatmul.mubr.bf16.gmra.mxu1 %v3721_v24 }
 0x136   :  { %1528 = vmatprep.mubr.bf16.mxu0 %v3897_v56  ;;  %1906 = vmatprep.mubr.bf16.mxu1 %v3723_v25  ;;  %v3925_v25 = vld [vmem:[#allocation3 + $0x1f8] ss:$12 sps:$4 sm:$0xff]  }
 0x137   :  { %v3907_v20 = vpop.f32.mrf.mxu1  ;;  %4533 = vst [vmem:[#allocation35_spill] sm:$0xff] %v3925_v25 }
 0x139   :  { %v3911_v0 = vpop.f32.mrf.mxu1 }
 0x13b   :  { %v3915_v14 = vpop.f32.mrf.mxu1 }
 0x13d   :  { %1529 = vmatmul.mubr.bf16.gmra.mxu0 %v3909_v21  ;;  %v3918_v16 = vpop.f32.mrf.mxu1  ;;  %1907 = vmatmul.mubr.bf16.gmra.mxu1 %v3731_v28 }
 0x13e   :  { %1538 = vmatprep.mubr.bf16.mxu0 %v3913_v53  ;;  %1914 = vmatprep.mubr.bf16.mxu1 %v3733_v29  ;;  %v3941_v29 = vld [vmem:[#allocation3 + $0x210] ss:$12 sps:$4 sm:$0xff]  }
 0x13f   :  { %v3923_v24 = vpop.f32.mrf.mxu1  ;;  %4535 = vst [vmem:[#allocation37_spill] sm:$0xff] %v3941_v29 }
 0x141   :  { %v3927_v56 = vpop.f32.mrf.mxu1 }
 0x143   :  { %v3931_v10 = vpop.f32.mrf.mxu1 }
 0x145   :  { %1539 = vmatmul.mubr.bf16.gmra.mxu0 %v3925_v25  ;;  %v3934_v21 = vpop.f32.mrf.mxu1  ;;  %1915 = vmatmul.mubr.bf16.gmra.mxu1 %v3741_v33 }
 0x146   :  { %1548 = vmatprep.mubr.bf16.mxu0 %v3929_v49  ;;  %1922 = vmatprep.mubr.bf16.mxu1 %v3743_v34  ;;  %v2729_v34 = vlaneseq  ;;  %v3957_v49 = vld [vmem:[#allocation3 + $0x228] ss:$12 sps:$4 sm:$0xff]  }
 0x147   :  { %v3939_v28 = vpop.f32.mrf.mxu1  ;;  %4537 = vst [vmem:[#allocation39_spill] sm:$0xff] %v3957_v49 }
 0x148   :  { %v3963_v35 = vshrl.u32 %v2729_v34, 7 }
 0x149   :  { %v3943_v53 = vpop.f32.mrf.mxu1 }
 0x14a   :  { %4539 = vst [vmem:[#allocation41_spill] sm:$0xff] %v3963_v35 }
 0x14b   :  { %v3947_v9 = vpop.f32.mrf.mxu1 }
 0x14d   :  { %1549 = vmatmul.mubr.bf16.gmra.mxu0 %v3941_v29  ;;  %v3950_v25 = vpop.f32.mrf.mxu1  ;;  %1923 = vmatmul.mubr.bf16.gmra.mxu1 %v3751_v36 }
 0x14e   :  { %1558 = vmatprep.mubr.bf16.mxu0 %v3945_v44  ;;  %1930 = vmatprep.mubr.bf16.mxu1 %v3753_v37  ;;  %v2731_v37 = vsub.s32 0, %v3963_v35  ;;  %v2727_v44 = vld [vmem:[%s4479_s2] sm:$0x7] }
 0x14f   :  { %v3955_v33 = vpop.f32.mrf.mxu1 }
 0x151   :  { %v3959_v39 = vpop.f32.mrf.mxu1 }
 0x153   :  { %v3961_v6 = vpop.f32.mrf.mxu1 }
 0x154   :  { %4538 = vst [vmem:[#allocation40_spill] sm:$0xff] %v3961_v6 }
 0x155   :  { %1559 = vmatmul.mubr.bf16.gmra.mxu0 %v3957_v49  ;;  %v3966_v29 = vpop.f32.mrf.mxu1  ;;  %1931 = vmatmul.mubr.bf16.gmra.mxu1 %v3761_v41  ;;  %v2735_v49 = vsub.s32 1, %v3963_v35 }
 0x156   :  { %4540 = vst [vmem:[#allocation42_spill] sm:$0xff] %v3966_v29  ;;  %3306 = vmatprep.mubr.bf16.mxu0 %v3653_v18  ;;  %1938 = vmatprep.mubr.bf16.mxu1 %v3763_v43  ;;  %v3982_v29 = vrot.slane %v2727_v44, %v2731_v37 }
 0x157   :  { %v3971_v36 = vpop.f32.mrf.mxu1 }
 0x158   :  { %4541 = vst [vmem:[#allocation43_spill] sm:$0xff] %v3971_v36  ;;  %v3989_v36 = vrot.slane %v2727_v44, %v2735_v49 }
 0x159   :  { %v3977_v34 = vpop.f32.mrf.mxu1 }
 0x15a   :  { %4542 = vst [vmem:[#allocation44_spill] sm:$0xff] %v3977_v34 }
 0x15b   :  { %v3980_v6 = vpop.f32.mrf.mxu1 }
 0x15c   :  { %4543 = vst [vmem:[#allocation45_spill] sm:$0xff] %v3980_v6 }
 0x15d   :  { %v1330_v41 = vpop.f32.mrf.mxu0  ;;  %3307 = vmatmul.mubr.bf16.vlgmr.msra.gmra.mxu0 %v3659_v38  ;;  %v3986_v43 = vpop.f32.mrf.mxu1  ;;  %1939 = vmatmul.mubr.bf16.gmra.mxu1 %v3771_v46 }
 0x15e   :  { %v1604_v18 = vadd.f32 %v3854_v23, %v1330_v41  ;;  %3310 = vmatprep.mubr.bf16.mxu0 %v3663_v42  ;;  %1946 = vmatprep.mubr.bf16.mxu1 %v3773_v48 }
 0x15f   :  { %v1332_v34 = vpop.f32.mrf.mxu0  ;;  %v3995_v6 = vpop.f32.mrf.mxu1 }
 0x160   :  { %v2744_v35 = vadd.f32 %v3982_v29, %v1604_v18  ;;  %v1606_v37 = vadd.f32 %v3859_v27, %v1332_v34 }
 0x161   :  { %v1334_v38 = vpop.f32.mrf.mxu0  ;;  %v3999_v46 = vpop.f32.mrf.mxu1 }
 0x162   :  { %2888 = vst [vmem:[#allocation8] sm:$0xff] %v2744_v35  ;;  %v2745_v23 = vadd.f32 %v3989_v36, %v1606_v37  ;;  %v1608_v41 = vadd.f32 %v3863_v40, %v1334_v38 }
 0x163   :  { %v1336_v44 = vpop.f32.mrf.mxu0  ;;  %v4003_v49 = vpop.f32.mrf.mxu1 }
 0x164   :  { %2889 = vst [vmem:[#allocation8 + $0x8] sm:$0xff] %v2745_v23  ;;  %v2747_v42 = vadd.f32 %v3982_v29, %v1608_v41  ;;  %v1610_v48 = vadd.f32 %v3867_v45, %v1336_v44 }
 0x165   :  { %v1340_v18 = vpop.f32.mrf.mxu0  ;;  %3311 = vmatmul.mubr.bf16.gmra.mxu0 %v3667_v47  ;;  %v4008_v34 = vpop.f32.mrf.mxu1  ;;  %1947 = vmatmul.mubr.bf16.gmra.mxu1 %v3781_v50 }
 0x166   :  { %2891 = vst [vmem:[#allocation8 + $0x18] sm:$0xff] %v2747_v42  ;;  %v2748_v35 = vadd.f32 %v3989_v36, %v1610_v48  ;;  %v1614_v27 = vadd.f32 %v3870_v7, %v1340_v18  ;;  %3314 = vmatprep.mubr.bf16.mxu0 %v3671_v52  ;;  %1954 = vmatprep.mubr.bf16.mxu1 %v3783_v51 }
 0x167   :  { %v1342_v40 = vpop.f32.mrf.mxu0  ;;  %v4015_v47 = vpop.f32.mrf.mxu1 }
 0x168   :  { %2892 = vst [vmem:[#allocation8 + $0x20] sm:$0xff] %v2748_v35  ;;  %v2750_v45 = vadd.f32 %v3982_v29, %v1614_v27  ;;  %v1616_v37 = vadd.f32 %v3875_v11, %v1342_v40 }
 0x169   :  { %v1344_v38 = vpop.f32.mrf.mxu0  ;;  %v4019_v41 = vpop.f32.mrf.mxu1 }
 0x16a   :  { %2894 = vst [vmem:[#allocation8 + $0x30] sm:$0xff] %v2750_v45  ;;  %v2751_v7 = vadd.f32 %v3989_v36, %v1616_v37  ;;  %v1618_v23 = vadd.f32 %v3879_v4, %v1344_v38 }
 0x16b   :  { %v1346_v50 = vpop.f32.mrf.mxu0  ;;  %v4023_v44 = vpop.f32.mrf.mxu1 }
 0x16c   :  { %2895 = vst [vmem:[#allocation8 + $0x38] sm:$0xff] %v2751_v7  ;;  %v2753_v52 = vadd.f32 %v3982_v29, %v1618_v23  ;;  %v1620_v51 = vadd.f32 %v3883_v60, %v1346_v50 }
 0x16d   :  { %v1350_v42 = vpop.f32.mrf.mxu0  ;;  %3315 = vmatmul.mubr.bf16.gmra.mxu0 %v3675_v57  ;;  %v4028_v18 = vpop.f32.mrf.mxu1  ;;  %1955 = vmatmul.mubr.bf16.gmra.mxu1 %v3791_v54 }
 0x16e   :  { %2897 = vst [vmem:[#allocation8 + $0x48] sm:$0xff] %v2753_v52  ;;  %v2754_v11 = vadd.f32 %v3989_v36, %v1620_v51  ;;  %v1624_v48 = vadd.f32 %v3886_v32, %v1350_v42  ;;  %3318 = vmatprep.mubr.bf16.mxu0 %v3679_v62  ;;  %1962 = vmatprep.mubr.bf16.mxu1 %v3793_v55 }
 0x16f   :  { %v1352_v4 = vpop.f32.mrf.mxu0  ;;  %v4035_v57 = vpop.f32.mrf.mxu1 }
 0x170   :  { %2898 = vst [vmem:[#allocation8 + $0x50] sm:$0xff] %v2754_v11  ;;  %v2756_v60 = vadd.f32 %v3982_v29, %v1624_v48  ;;  %v1626_v35 = vadd.f32 %v3891_v15, %v1352_v4 }
 0x171   :  { %v1354_v27 = vpop.f32.mrf.mxu0  ;;  %v4039_v45 = vpop.f32.mrf.mxu1 }
 0x172   :  { %2900 = vst [vmem:[#allocation8 + $0x60] sm:$0xff] %v2756_v60  ;;  %v2757_v32 = vadd.f32 %v3989_v36, %v1626_v35  ;;  %v1628_v40 = vadd.f32 %v3895_v31, %v1354_v27 }
 0x173   :  { %v1356_v54 = vpop.f32.mrf.mxu0  ;;  %v4043_v37 = vpop.f32.mrf.mxu1 }
 0x174   :  { %2901 = vst [vmem:[#allocation8 + $0x68] sm:$0xff] %v2757_v32  ;;  %v2759_v62 = vadd.f32 %v3982_v29, %v1628_v40  ;;  %v1630_v55 = vadd.f32 %v3899_v19, %v1356_v54 }
 0x175   :  { %v1360_v38 = vpop.f32.mrf.mxu0  ;;  %3319 = vmatmul.mubr.bf16.gmra.mxu0 %v3683_v3  ;;  %v4048_v23 = vpop.f32.mrf.mxu1  ;;  %1963 = vmatmul.mubr.bf16.gmra.mxu1 %v3801_v58 }
 0x176   :  { %2903 = vst [vmem:[#allocation8 + $0x78] sm:$0xff] %v2759_v62  ;;  %v2760_v15 = vadd.f32 %v3989_v36, %v1630_v55  ;;  %v1634_v7 = vadd.f32 %v3902_v12, %v1360_v38  ;;  %3322 = vmatprep.mubr.bf16.mxu0 %v3687_v8  ;;  %1970 = vmatprep.mubr.bf16.mxu1 %v3803_v59 }
 0x177   :  { %v1362_v31 = vpop.f32.mrf.mxu0  ;;  %v4055_v3 = vpop.f32.mrf.mxu1 }
 0x178   :  { %2904 = vst [vmem:[#allocation8 + $0x80] sm:$0xff] %v2760_v15  ;;  %v2762_v19 = vadd.f32 %v3982_v29, %v1634_v7  ;;  %v1636_v50 = vadd.f32 %v3907_v20, %v1362_v31 }
 0x179   :  { %v1364_v52 = vpop.f32.mrf.mxu0  ;;  %v4059_v42 = vpop.f32.mrf.mxu1 }
 0x17a   :  { %2906 = vst [vmem:[#allocation8 + $0x90] sm:$0xff] %v2762_v19  ;;  %v2763_v12 = vadd.f32 %v3989_v36, %v1636_v50  ;;  %v1638_v51 = vadd.f32 %v3911_v0, %v1364_v52 }
 0x17b   :  { %v1366_v58 = vpop.f32.mrf.mxu0  ;;  %v4063_v11 = vpop.f32.mrf.mxu1 }
 0x17c   :  { %2907 = vst [vmem:[#allocation8 + $0x98] sm:$0xff] %v2763_v12  ;;  %v2765_v8 = vadd.f32 %v3982_v29, %v1638_v51  ;;  %v1640_v59 = vadd.f32 %v3915_v14, %v1366_v58 }
 0x17d   :  { %v1370_v48 = vpop.f32.mrf.mxu0  ;;  %3323 = vmatmul.mubr.bf16.gmra.mxu0 %v3695_v13  ;;  %v4068_v60 = vpop.f32.mrf.mxu1  ;;  %1971 = vmatmul.mubr.bf16.gmra.mxu1 %v3811_v61 }
 0x17e   :  { %2909 = vst [vmem:[#allocation8 + $0xa8] sm:$0xff] %v2765_v8  ;;  %v2766_v20 = vadd.f32 %v3989_v36, %v1640_v59  ;;  %v1644_v4 = vadd.f32 %v3918_v16, %v1370_v48  ;;  %3326 = vmatprep.mubr.bf16.mxu0 %v3705_v17  ;;  %1978 = vmatprep.mubr.bf16.mxu1 %v3813_v63  ;;  %v4545_v8 = vld [vmem:[#allocation21_spill] sm:$0xff] }
 0x17f   :  { %v1372_v0 = vpop.f32.mrf.mxu0  ;;  %v4075_v13 = vpop.f32.mrf.mxu1 }
 0x180   :  { %2910 = vst [vmem:[#allocation8 + $0xb0] sm:$0xff] %v2766_v20  ;;  %v2768_v14 = vadd.f32 %v3982_v29, %v1644_v4  ;;  %v1646_v35 = vadd.f32 %v3923_v24, %v1372_v0 }
 0x181   :  { %v1374_v27 = vpop.f32.mrf.mxu0  ;;  %v4079_v40 = vpop.f32.mrf.mxu1 }
 0x182   :  { %2912 = vst [vmem:[#allocation8 + $0xc0] sm:$0xff] %v2768_v14  ;;  %v2769_v16 = vadd.f32 %v3989_v36, %v1646_v35  ;;  %v1648_v32 = vadd.f32 %v3927_v56, %v1374_v27  ;;  %v4546_v14 = vld [vmem:[#allocation40_spill] sm:$0xff] }
 0x183   :  { %v1376_v61 = vpop.f32.mrf.mxu0  ;;  %v4083_v54 = vpop.f32.mrf.mxu1 }
 0x184   :  { %2913 = vst [vmem:[#allocation8 + $0xc8] sm:$0xff] %v2769_v16  ;;  %v2771_v17 = vadd.f32 %v3982_v29, %v1648_v32  ;;  %v1650_v63 = vadd.f32 %v3931_v10, %v1376_v61  ;;  %v4548_v61 = vld [vmem:[#allocation42_spill] sm:$0xff] }
 0x185   :  { %v1380_v62 = vpop.f32.mrf.mxu0  ;;  %3327 = vmatmul.mubr.bf16.gmra.mxu0 %v3715_v22  ;;  %v4088_v38 = vpop.f32.mrf.mxu1  ;;  %1979 = vmatmul.mubr.bf16.gmra.mxu1 %v3821_v1 }
 0x186   :  { %2915 = vst [vmem:[#allocation8 + $0xd8] sm:$0xff] %v2771_v17  ;;  %v2772_v24 = vadd.f32 %v3989_v36, %v1650_v63  ;;  %v1654_v55 = vadd.f32 %v3934_v21, %v1380_v62  ;;  %3330 = vmatprep.mubr.bf16.mxu0 %v3725_v26  ;;  %1986 = vmatprep.mubr.bf16.mxu1 %v3823_v2  ;;  %v4550_v62 = vld [vmem:[#allocation14_spill] sm:$0xff] }
 0x187   :  { %v1382_v56 = vpop.f32.mrf.mxu0  ;;  %v4095_v22 = vpop.f32.mrf.mxu1 }
 0x188   :  { %2916 = vst [vmem:[#allocation8 + $0xe0] sm:$0xff] %v2772_v24  ;;  %v2774_v10 = vadd.f32 %v3982_v29, %v1654_v55  ;;  %v1656_v15 = vadd.f32 %v3939_v28, %v1382_v56  ;;  %v4551_v55 = vld [vmem:[#allocation24_spill] sm:$0xff] }
 0x189   :  { %v1384_v7 = vpop.f32.mrf.mxu0  ;;  %v4099_v19 = vpop.f32.mrf.mxu1 }
 0x18a   :  { %2918 = vst [vmem:[#allocation8 + $0xf0] sm:$0xff] %v2774_v10  ;;  %v2775_v21 = vadd.f32 %v3989_v36, %v1656_v15  ;;  %v1658_v31 = vadd.f32 %v3943_v53, %v1384_v7  ;;  %v4544_v53 = vld [vmem:[#allocation12_spill] sm:$0xff]  ;;  %v4552_v10 = vld [vmem:[#allocation43_spill] sm:$0xff] }
 0x18b   :  { %v1386_v1 = vpop.f32.mrf.mxu0  ;;  %v4103_v50 = vpop.f32.mrf.mxu1 }
 0x18c   :  { %2919 = vst [vmem:[#allocation8 + $0xf8] sm:$0xff] %v2775_v21  ;;  %v2777_v26 = vadd.f32 %v3982_v29, %v1658_v31  ;;  %v1660_v2 = vadd.f32 %v3947_v9, %v1386_v1  ;;  %v4553_v1 = vld [vmem:[#allocation44_spill] sm:$0xff] }
 0x18d   :  { %v1390_v52 = vpop.f32.mrf.mxu0  ;;  %3331 = vmatmul.mubr.bf16.gmra.mxu0 %v3735_v30  ;;  %v4108_v51 = vpop.f32.mrf.mxu1  ;;  %1987 = vmatmul.mubr.bf16.gmra.mxu1 %v3831_v5 }
 0x18e   :  { %2921 = vst [vmem:[#allocation8 + $0x108] sm:$0xff] %v2777_v26  ;;  %v2778_v28 = vadd.f32 %v3989_v36, %v1660_v2  ;;  %v1664_v12 = vadd.f32 %v3950_v25, %v1390_v52  ;;  %3334 = vmatprep.mubr.bf16.mxu0 %v4544_v53  ;;  %1994 = vmatprep.mubr.bf16.mxu1 %v4545_v8 }
 0x18f   :  { %v1392_v58 = vpop.f32.mrf.mxu0  ;;  %v4115_v30 = vpop.f32.mrf.mxu1 }
 0x190   :  { %2922 = vst [vmem:[#allocation8 + $0x110] sm:$0xff] %v2778_v28  ;;  %v2780_v9 = vadd.f32 %v3982_v29, %v1664_v12  ;;  %v1666_v59 = vadd.f32 %v3955_v33, %v1392_v58  ;;  %v4547_v33 = vld [vmem:[#allocation13_spill] sm:$0xff] }
 0x191   :  { %v1394_v48 = vpop.f32.mrf.mxu0  ;;  %v4119_v4 = vpop.f32.mrf.mxu1  ;;  %v4554_v12 = vld [vmem:[#allocation45_spill] sm:$0xff] }
 0x192   :  { %2924 = vst [vmem:[#allocation8 + $0x120] sm:$0xff] %v2780_v9  ;;  %v2781_v25 = vadd.f32 %v3989_v36, %v1666_v59  ;;  %v1668_v20 = vadd.f32 %v3959_v39, %v1394_v48  ;;  %v4549_v39 = vld [vmem:[#allocation23_spill] sm:$0xff] }
 0x193   :  { %v1396_v5 = vpop.f32.mrf.mxu0  ;;  %v4123_v27 = vpop.f32.mrf.mxu1  ;;  %v4555_v9 = vld [vmem:[#allocation15_spill] sm:$0xff] }
 0x194   :  { %2925 = vst [vmem:[#allocation8 + $0x128] sm:$0xff] %v2781_v25  ;;  %v2783_v0 = vadd.f32 %v3982_v29, %v1668_v20  ;;  %v1670_v35 = vadd.f32 %v4546_v14, %v1396_v5  ;;  %v4556_v20 = vld [vmem:[#allocation25_spill] sm:$0xff]  ;;  %v4557_v5 = vld [vmem:[#allocation16_spill] sm:$0xff]  ;;  %v4558_v14 = vld [vmem:[#allocation26_spill] sm:$0xff] }
 0x195   :  { %v1400_v16 = vpop.f32.mrf.mxu0  ;;  %3335 = vmatmul.mubr.bf16.gmra.mxu0 %v4547_v33  ;;  %v4128_v63 = vpop.f32.mrf.mxu1  ;;  %1995 = vmatmul.mubr.bf16.gmra.mxu1 %v4549_v39 }
 0x196   :  { %2927 = vst [vmem:[#allocation8 + $0x138] sm:$0xff] %v2783_v0  ;;  %v2784_v32 = vadd.f32 %v3989_v36, %v1670_v35  ;;  %v1674_v17 = vadd.f32 %v4548_v61, %v1400_v16  ;;  %3338 = vmatprep.mubr.bf16.mxu0 %v4550_v62  ;;  %2002 = vmatprep.mubr.bf16.mxu1 %v4551_v55 }
 0x197   :  { %v1402_v24 = vpop.f32.mrf.mxu0  ;;  %v4135_v7 = vpop.f32.mrf.mxu1 }
 0x198   :  { %2928 = vst [vmem:[#allocation8 + $0x140] sm:$0xff] %v2784_v32  ;;  %v2786_v56 = vadd.f32 %v3982_v29, %v1674_v17  ;;  %v1676_v15 = vadd.f32 %v4552_v10, %v1402_v24 }
 0x199   :  { %v1404_v21 = vpop.f32.mrf.mxu0  ;;  %v4139_v2 = vpop.f32.mrf.mxu1 }
 0x19a   :  { %2930 = vst [vmem:[#allocation8 + $0x150] sm:$0xff] %v2786_v56  ;;  %v2787_v31 = vadd.f32 %v3989_v36, %v1676_v15  ;;  %v1678_v26 = vadd.f32 %v4553_v1, %v1404_v21 }
 0x19b   :  { %v1406_v52 = vpop.f32.mrf.mxu0  ;;  %v4143_v58 = vpop.f32.mrf.mxu1 }
 0x19c   :  { %2931 = vst [vmem:[#allocation8 + $0x158] sm:$0xff] %v2787_v31  ;;  %v2789_v28 = vadd.f32 %v3982_v29, %v1678_v26  ;;  %v1680_v53 = vadd.f32 %v4554_v12, %v1406_v52  ;;  %v4561_v31 = vld [vmem:[#allocation18_spill] sm:$0xff]  ;;  %v4562_v26 = vld [vmem:[#allocation28_spill] sm:$0xff] }
 0x19d   :  { %v1410_v8 = vpop.f32.mrf.mxu0  ;;  %3339 = vmatmul.mubr.bf16.gmra.mxu0 %v4555_v9  ;;  %v4148_v25 = vpop.f32.mrf.mxu1  ;;  %2003 = vmatmul.mubr.bf16.gmra.mxu1 %v4556_v20 }
 0x19e   :  { %2933 = vst [vmem:[#allocation8 + $0x168] sm:$0xff] %v2789_v28  ;;  %v2790_v59 = vadd.f32 %v3989_v36, %v1680_v53  ;;  %v1684_v48 = vadd.f32 %v3986_v43, %v1410_v8  ;;  %3342 = vmatprep.mubr.bf16.mxu0 %v4557_v5  ;;  %2010 = vmatprep.mubr.bf16.mxu1 %v4558_v14 }
 0x19f   :  { %v1412_v0 = vpop.f32.mrf.mxu0  ;;  %v4155_v33 = vpop.f32.mrf.mxu1 }
 0x1a0   :  { %2934 = vst [vmem:[#allocation8 + $0x170] sm:$0xff] %v2790_v59  ;;  %v2792_v35 = vadd.f32 %v3982_v29, %v1684_v48  ;;  %v1686_v16 = vadd.f32 %v3995_v6, %v1412_v0  ;;  %v4559_v6 = vld [vmem:[#allocation17_spill] sm:$0xff] }
 0x1a1   :  { %v1414_v32 = vpop.f32.mrf.mxu0  ;;  %v4159_v17 = vpop.f32.mrf.mxu1 }
 0x1a2   :  { %2936 = vst [vmem:[#allocation8 + $0x180] sm:$0xff] %v2792_v35  ;;  %v2793_v43 = vadd.f32 %v3989_v36, %v1686_v16  ;;  %v1688_v61 = vadd.f32 %v3999_v46, %v1414_v32  ;;  %v4560_v46 = vld [vmem:[#allocation27_spill] sm:$0xff]  ;;  %v4565_v16 = vld [vmem:[#allocation20_spill] sm:$0xff] }
 0x1a3   :  { %v1416_v39 = vpop.f32.mrf.mxu0  ;;  %v4163_v55 = vpop.f32.mrf.mxu1 }
 0x1a4   :  { %2937 = vst [vmem:[#allocation8 + $0x188] sm:$0xff] %v2793_v43  ;;  %v2795_v62 = vadd.f32 %v3982_v29, %v1688_v61  ;;  %v1690_v24 = vadd.f32 %v4003_v49, %v1416_v39  ;;  %v4566_v43 = vld [vmem:[#allocation30_spill] sm:$0xff] }
 0x1a5   :  { %v1420_v56 = vpop.f32.mrf.mxu0  ;;  %3343 = vmatmul.mubr.bf16.gmra.mxu0 %v4559_v6  ;;  %v4168_v21 = vpop.f32.mrf.mxu1  ;;  %2011 = vmatmul.mubr.bf16.gmra.mxu1 %v4560_v46 }
 0x1a6   :  { %2939 = vst [vmem:[#allocation8 + $0x198] sm:$0xff] %v2795_v62  ;;  %v2796_v10 = vadd.f32 %v3989_v36, %v1690_v24  ;;  %v1694_v15 = vadd.f32 %v4008_v34, %v1420_v56  ;;  %3346 = vmatprep.mubr.bf16.mxu0 %v4561_v31  ;;  %2018 = vmatprep.mubr.bf16.mxu1 %v4562_v26 }
 0x1a7   :  { %v1422_v1 = vpop.f32.mrf.mxu0  ;;  %v4175_v28 = vpop.f32.mrf.mxu1 }
 0x1a8   :  { %2940 = vst [vmem:[#allocation8 + $0x1a0] sm:$0xff] %v2796_v10  ;;  %v2798_v49 = vadd.f32 %v3982_v29, %v1694_v15  ;;  %v1696_v52 = vadd.f32 %v4015_v47, %v1422_v1  ;;  %v4563_v47 = vld [vmem:[#allocation19_spill] sm:$0xff] }
 0x1a9   :  { %v1424_v12 = vpop.f32.mrf.mxu0  ;;  %v4179_v8 = vpop.f32.mrf.mxu1 }
 0x1aa   :  { %2942 = vst [vmem:[#allocation8 + $0x1b0] sm:$0xff] %v2798_v49  ;;  %v2799_v34 = vadd.f32 %v3989_v36, %v1696_v52  ;;  %v1698_v53 = vadd.f32 %v4019_v41, %v1424_v12  ;;  %v4564_v41 = vld [vmem:[#allocation29_spill] sm:$0xff]  ;;  %v4569_v12 = vld [vmem:[#allocation32_spill] sm:$0xff] }
 0x1ab   :  { %v1426_v9 = vpop.f32.mrf.mxu0  ;;  %v4183_v20 = vpop.f32.mrf.mxu1 }
 0x1ac   :  { %2943 = vst [vmem:[#allocation8 + $0x1b8] sm:$0xff] %v2799_v34  ;;  %v2801_v59 = vadd.f32 %v3982_v29, %v1698_v53  ;;  %v1700_v48 = vadd.f32 %v4023_v44, %v1426_v9 }
 0x1ad   :  { %v1430_v5 = vpop.f32.mrf.mxu0  ;;  %3347 = vmatmul.mubr.bf16.gmra.mxu0 %v4563_v47  ;;  %v4188_v35 = vpop.f32.mrf.mxu1  ;;  %2019 = vmatmul.mubr.bf16.gmra.mxu1 %v4564_v41 }
 0x1ae   :  { %2945 = vst [vmem:[#allocation8 + $0x1c8] sm:$0xff] %v2801_v59  ;;  %v2802_v0 = vadd.f32 %v3989_v36, %v1700_v48  ;;  %v1704_v14 = vadd.f32 %v4028_v18, %v1430_v5  ;;  %3350 = vmatprep.mubr.bf16.mxu0 %v4565_v16  ;;  %2026 = vmatprep.mubr.bf16.mxu1 %v4566_v43  ;;  %v4570_v43 = vld [vmem:[#allocation33_spill] sm:$0xff] }
 0x1af   :  { %v1432_v32 = vpop.f32.mrf.mxu0  ;;  %v4195_v39 = vpop.f32.mrf.mxu1 }
 0x1b0   :  { %2946 = vst [vmem:[#allocation8 + $0x1d0] sm:$0xff] %v2802_v0  ;;  %v2804_v44 = vadd.f32 %v3982_v29, %v1704_v14  ;;  %v1706_v61 = vadd.f32 %v4035_v57, %v1432_v32  ;;  %v4567_v57 = vld [vmem:[#allocation22_spill] sm:$0xff] }
 0x1b1   :  { %v1434_v62 = vpop.f32.mrf.mxu0  ;;  %v4199_v56 = vpop.f32.mrf.mxu1 }
 0x1b2   :  { %2948 = vst [vmem:[#allocation8 + $0x1e0] sm:$0xff] %v2804_v44  ;;  %v2805_v18 = vadd.f32 %v3989_v36, %v1706_v61  ;;  %v1708_v24 = vadd.f32 %v4039_v45, %v1434_v62  ;;  %v4568_v45 = vld [vmem:[#allocation31_spill] sm:$0xff]  ;;  %v4571_v44 = vld [vmem:[#allocation34_spill] sm:$0xff] }
 0x1b3   :  { %v1436_v6 = vpop.f32.mrf.mxu0  ;;  %v4203_v46 = vpop.f32.mrf.mxu1 }
 0x1b4   :  { %2949 = vst [vmem:[#allocation8 + $0x1e8] sm:$0xff] %v2805_v18  ;;  %v2807_v10 = vadd.f32 %v3982_v29, %v1708_v24  ;;  %v1710_v15 = vadd.f32 %v4043_v37, %v1436_v6 }
 0x1b5   :  { %v1440_v31 = vpop.f32.mrf.mxu0  ;;  %3351 = vmatmul.mubr.bf16.gmra.mxu0 %v4567_v57  ;;  %v4208_v49 = vpop.f32.mrf.mxu1  ;;  %2027 = vmatmul.mubr.bf16.gmra.mxu1 %v4568_v45 }
 0x1b6   :  { %2951 = vst [vmem:[#allocation8 + $0x1f8] sm:$0xff] %v2807_v10  ;;  %v2808_v1 = vadd.f32 %v3989_v36, %v1710_v15  ;;  %v1714_v26 = vadd.f32 %v4048_v23, %v1440_v31  ;;  %2034 = vmatprep.mubr.bf16.mxu1 %v4569_v12  ;;  %v4573_v12 = vld [vmem:[#allocation36_spill] sm:$0xff] }
 0x1b7   :  { %v1442_v52 = vpop.f32.mrf.mxu0  ;;  %v4214_v53 = vpop.f32.mrf.mxu1 }
 0x1b8   :  { %2952 = vst [vmem:[#allocation8 + $0x200] sm:$0xff] %v2808_v1  ;;  %v2810_v37 = vadd.f32 %v3982_v29, %v1714_v26  ;;  %v1716_v34 = vadd.f32 %v4055_v3, %v1442_v52  ;;  %v4572_v52 = vld [vmem:[#allocation35_spill] sm:$0xff] }
 0x1b9   :  { %v1444_v9 = vpop.f32.mrf.mxu0  ;;  %v4218_v48 = vpop.f32.mrf.mxu1 }
 0x1ba   :  { %2954 = vst [vmem:[#allocation8 + $0x210] sm:$0xff] %v2810_v37  ;;  %v2811_v59 = vadd.f32 %v3989_v36, %v1716_v34  ;;  %v1718_v23 = vadd.f32 %v4059_v42, %v1444_v9 }
 0x1bb   :  { %v1446_v5 = vpop.f32.mrf.mxu0  ;;  %v4222_v14 = vpop.f32.mrf.mxu1 }
 0x1bc   :  { %2955 = vst [vmem:[#allocation8 + $0x218] sm:$0xff] %v2811_v59  ;;  %v2813_v47 = vadd.f32 %v3982_v29, %v1718_v23  ;;  %v1720_v0 = vadd.f32 %v4063_v11, %v1446_v5 }
 0x1bd   :  { %v1450_v41 = vpop.f32.mrf.mxu0  ;;  %v4226_v32 = vpop.f32.mrf.mxu1  ;;  %2035 = vmatmul.mubr.bf16.gmra.mxu1 %v4570_v43 }
 0x1be   :  { %2957 = vst [vmem:[#allocation8 + $0x228] sm:$0xff] %v2813_v47  ;;  %v2814_v3 = vadd.f32 %v3989_v36, %v1720_v0  ;;  %v1724_v16 = vadd.f32 %v4068_v60, %v1450_v41  ;;  %2042 = vmatprep.mubr.bf16.mxu1 %v4571_v44  ;;  %v4575_v44 = vld [vmem:[#allocation38_spill] sm:$0xff] }
 0x1bf   :  { %v1452_v42 = vpop.f32.mrf.mxu0  ;;  %v4232_v62 = vpop.f32.mrf.mxu1 }
 0x1c0   :  { %2958 = vst [vmem:[#allocation8 + $0x230] sm:$0xff] %v2814_v3  ;;  %v2816_v61 = vadd.f32 %v3982_v29, %v1724_v16  ;;  %v1726_v11 = vadd.f32 %v4075_v13, %v1452_v42  ;;  %v4574_v42 = vld [vmem:[#allocation37_spill] sm:$0xff] }
 0x1c1   :  { %v1454_v18 = vpop.f32.mrf.mxu0  ;;  %v4236_v6 = vpop.f32.mrf.mxu1 }
 0x1c2   :  { %2960 = vst [vmem:[#allocation8 + $0x240] sm:$0xff] %v2816_v61  ;;  %v2817_v24 = vadd.f32 %v3989_v36, %v1726_v11  ;;  %v1728_v60 = vadd.f32 %v4079_v40, %v1454_v18 }
 0x1c3   :  { %v1456_v10 = vpop.f32.mrf.mxu0  ;;  %v4240_v57 = vpop.f32.mrf.mxu1 }
 0x1c4   :  { %2961 = vst [vmem:[#allocation8 + $0x248] sm:$0xff] %v2817_v24  ;;  %v2819_v15 = vadd.f32 %v3982_v29, %v1728_v60  ;;  %v1730_v31 = vadd.f32 %v4083_v54, %v1456_v10 }
 0x1c5   :  { %v1460_v1 = vpop.f32.mrf.mxu0  ;;  %v4244_v45 = vpop.f32.mrf.mxu1  ;;  %2043 = vmatmul.mubr.bf16.gmra.mxu1 %v4572_v52 }
 0x1c6   :  { %2963 = vst [vmem:[#allocation8 + $0x258] sm:$0xff] %v2819_v15  ;;  %v2820_v13 = vadd.f32 %v3989_v36, %v1730_v31  ;;  %v1734_v26 = vadd.f32 %v4088_v38, %v1460_v1  ;;  %2050 = vmatprep.mubr.bf16.mxu1 %v4573_v12 }
 0x1c7   :  { %v1462_v40 = vpop.f32.mrf.mxu0  ;;  %v4250_v34 = vpop.f32.mrf.mxu1 }
 0x1c8   :  { %2964 = vst [vmem:[#allocation8 + $0x260] sm:$0xff] %v2820_v13  ;;  %v2822_v37 = vadd.f32 %v3982_v29, %v1734_v26  ;;  %v1736_v54 = vadd.f32 %v4095_v22, %v1462_v40  ;;  %v4576_v40 = vld [vmem:[#allocation39_spill] sm:$0xff] }
 0x1c9   :  { %v1464_v9 = vpop.f32.mrf.mxu0  ;;  %v4254_v23 = vpop.f32.mrf.mxu1 }
 0x1ca   :  { %2966 = vst [vmem:[#allocation8 + $0x270] sm:$0xff] %v2822_v37  ;;  %v2823_v59 = vadd.f32 %v3989_v36, %v1736_v54  ;;  %v1738_v38 = vadd.f32 %v4099_v19, %v1464_v9 }
 0x1cb   :  { %v1466_v5 = vpop.f32.mrf.mxu0  ;;  %v4258_v41 = vpop.f32.mrf.mxu1 }
 0x1cc   :  { %2967 = vst [vmem:[#allocation8 + $0x278] sm:$0xff] %v2823_v59  ;;  %v2825_v47 = vadd.f32 %v3982_v29, %v1738_v38  ;;  %v1740_v0 = vadd.f32 %v4103_v50, %v1466_v5 }
 0x1cd   :  { %v1470_v3 = vpop.f32.mrf.mxu0  ;;  %v4262_v43 = vpop.f32.mrf.mxu1  ;;  %2051 = vmatmul.mubr.bf16.gmra.mxu1 %v4574_v42 }
 0x1ce   :  { %2969 = vst [vmem:[#allocation8 + $0x288] sm:$0xff] %v2825_v47  ;;  %v2826_v22 = vadd.f32 %v3989_v36, %v1740_v0  ;;  %v1744_v16 = vadd.f32 %v4108_v51, %v1470_v3  ;;  %2058 = vmatprep.mubr.bf16.mxu1 %v4575_v44 }
 0x1cf   :  { %v1472_v19 = vpop.f32.mrf.mxu0  ;;  %v4268_v11 = vpop.f32.mrf.mxu1 }
 0x1d0   :  { %2970 = vst [vmem:[#allocation8 + $0x290] sm:$0xff] %v2826_v22  ;;  %v2828_v61 = vadd.f32 %v3982_v29, %v1744_v16  ;;  %v1746_v50 = vadd.f32 %v4115_v30, %v1472_v19 }
 0x1d1   :  { %v1474_v18 = vpop.f32.mrf.mxu0  ;;  %v4272_v60 = vpop.f32.mrf.mxu1 }
 0x1d2   :  { %2972 = vst [vmem:[#allocation8 + $0x2a0] sm:$0xff] %v2828_v61  ;;  %v2829_v24 = vadd.f32 %v3989_v36, %v1746_v50  ;;  %v1748_v51 = vadd.f32 %v4119_v4, %v1474_v18 }
 0x1d3   :  { %v1476_v10 = vpop.f32.mrf.mxu0  ;;  %v4276_v1 = vpop.f32.mrf.mxu1 }
 0x1d4   :  { %2973 = vst [vmem:[#allocation8 + $0x2a8] sm:$0xff] %v2829_v24  ;;  %v2831_v15 = vadd.f32 %v3982_v29, %v1748_v51  ;;  %v1750_v31 = vadd.f32 %v4123_v27, %v1476_v10 }
 0x1d5   :  { %v1480_v13 = vpop.f32.mrf.mxu0  ;;  %v4280_v52 = vpop.f32.mrf.mxu1  ;;  %2059 = vmatmul.mubr.bf16.gmra.mxu1 %v4576_v40 }
 0x1d6   :  { %2975 = vst [vmem:[#allocation8 + $0x2b8] sm:$0xff] %v2831_v15  ;;  %v2832_v30 = vadd.f32 %v3989_v36, %v1750_v31  ;;  %v1754_v26 = vadd.f32 %v4128_v63, %v1480_v13 }
 0x1d7   :  { %v1482_v4 = vpop.f32.mrf.mxu0  ;;  %v4285_v54 = vpop.f32.mrf.mxu1 }
 0x1d8   :  { %2976 = vst [vmem:[#allocation8 + $0x2c0] sm:$0xff] %v2832_v30  ;;  %v2834_v12 = vadd.f32 %v3982_v29, %v1754_v26  ;;  %v1756_v37 = vadd.f32 %v4135_v7, %v1482_v4 }
 0x1d9   :  { %v1484_v27 = vpop.f32.mrf.mxu0  ;;  %v4289_v38 = vpop.f32.mrf.mxu1 }
 0x1da   :  { %2978 = vst [vmem:[#allocation8 + $0x2d0] sm:$0xff] %v2834_v12  ;;  %v2835_v9 = vadd.f32 %v3989_v36, %v1756_v37  ;;  %v1758_v59 = vadd.f32 %v4139_v2, %v1484_v27 }
 0x1db   :  { %v1486_v63 = vpop.f32.mrf.mxu0  ;;  %v4293_v0 = vpop.f32.mrf.mxu1 }
 0x1dc   :  { %2979 = vst [vmem:[#allocation8 + $0x2d8] sm:$0xff] %v2835_v9  ;;  %v2837_v5 = vadd.f32 %v3982_v29, %v1758_v59  ;;  %v1760_v47 = vadd.f32 %v4143_v58, %v1486_v63 }
 0x1dd   :  { %v1490_v3 = vpop.f32.mrf.mxu0  ;;  %v4297_v16 = vpop.f32.mrf.mxu1 }
 0x1de   :  { %2981 = vst [vmem:[#allocation8 + $0x2e8] sm:$0xff] %v2837_v5  ;;  %v2838_v7 = vadd.f32 %v3989_v36, %v1760_v47  ;;  %v1764_v22 = vadd.f32 %v4148_v25, %v1490_v3 }
 0x1df   :  { %v1492_v42 = vpop.f32.mrf.mxu0  ;;  %v1878_v44 = vpop.f32.mrf.mxu1 }
 0x1e0   :  { %2982 = vst [vmem:[#allocation8 + $0x2f0] sm:$0xff] %v2838_v7  ;;  %v2840_v2 = vadd.f32 %v3982_v29, %v1764_v22  ;;  %v1766_v19 = vadd.f32 %v4155_v33, %v1492_v42 }
 0x1e1   :  { %v1494_v61 = vpop.f32.mrf.mxu0  ;;  %v4303_v18 = vpop.f32.mrf.mxu1 }
 0x1e2   :  { %2984 = vst [vmem:[#allocation8 + $0x300] sm:$0xff] %v2840_v2  ;;  %v2841_v58 = vadd.f32 %v3989_v36, %v1766_v19  ;;  %v1768_v50 = vadd.f32 %v4159_v17, %v1494_v61 }
 0x1e3   :  { %v1496_v24 = vpop.f32.mrf.mxu0  ;;  %v1881_v10 = vpop.f32.mrf.mxu1 }
 0x1e4   :  { %2985 = vst [vmem:[#allocation8 + $0x308] sm:$0xff] %v2841_v58  ;;  %v2843_v25 = vadd.f32 %v3982_v29, %v1768_v50  ;;  %v1770_v51 = vadd.f32 %v4163_v55, %v1496_v24 }
 0x1e5   :  { %v1500_v15 = vpop.f32.mrf.mxu0  ;;  %v4309_v13 = vpop.f32.mrf.mxu1 }
 0x1e6   :  { %2987 = vst [vmem:[#allocation8 + $0x318] sm:$0xff] %v2843_v25  ;;  %v2844_v33 = vadd.f32 %v3989_v36, %v1770_v51  ;;  %v1774_v31 = vadd.f32 %v4168_v21, %v1500_v15 }
 0x1e7   :  { %v1502_v30 = vpop.f32.mrf.mxu0  ;;  %v1886_v40 = vpop.f32.mrf.mxu1 }
 0x1e8   :  { %2988 = vst [vmem:[#allocation8 + $0x320] sm:$0xff] %v2844_v33  ;;  %v2846_v17 = vadd.f32 %v3982_v29, %v1774_v31  ;;  %v1776_v26 = vadd.f32 %v4175_v28, %v1502_v30 }
 0x1e9   :  { %v1504_v4 = vpop.f32.mrf.mxu0  ;;  %v4315_v37 = vpop.f32.mrf.mxu1 }
 0x1ea   :  { %2990 = vst [vmem:[#allocation8 + $0x330] sm:$0xff] %v2846_v17  ;;  %v2847_v55 = vadd.f32 %v3989_v36, %v1776_v26  ;;  %v1778_v12 = vadd.f32 %v4179_v8, %v1504_v4 }
 0x1eb   :  { %v1506_v27 = vpop.f32.mrf.mxu0  ;;  %v1889_v59 = vpop.f32.mrf.mxu1 }
 0x1ec   :  { %2991 = vst [vmem:[#allocation8 + $0x338] sm:$0xff] %v2847_v55  ;;  %v2849_v21 = vadd.f32 %v3982_v29, %v1778_v12  ;;  %v1780_v9 = vadd.f32 %v4183_v20, %v1506_v27 }
 0x1ed   :  { %v1510_v63 = vpop.f32.mrf.mxu0  ;;  %v4321_v47 = vpop.f32.mrf.mxu1 }
 0x1ee   :  { %2993 = vst [vmem:[#allocation8 + $0x348] sm:$0xff] %v2849_v21  ;;  %v2850_v28 = vadd.f32 %v3989_v36, %v1780_v9  ;;  %v1784_v5 = vadd.f32 %v4188_v35, %v1510_v63 }
 0x1ef   :  { %v1512_v3 = vpop.f32.mrf.mxu0  ;;  %v1894_v22 = vpop.f32.mrf.mxu1 }
 0x1f0   :  { %2994 = vst [vmem:[#allocation8 + $0x350] sm:$0xff] %v2850_v28  ;;  %v2852_v8 = vadd.f32 %v3982_v29, %v1784_v5  ;;  %v1786_v7 = vadd.f32 %v4195_v39, %v1512_v3 }
 0x1f1   :  { %v1514_v42 = vpop.f32.mrf.mxu0  ;;  %v4327_v19 = vpop.f32.mrf.mxu1 }
 0x1f2   :  { %2996 = vst [vmem:[#allocation8 + $0x360] sm:$0xff] %v2852_v8  ;;  %v2853_v20 = vadd.f32 %v3989_v36, %v1786_v7  ;;  %v1788_v2 = vadd.f32 %v4199_v56, %v1514_v42 }
 0x1f3   :  { %v1516_v44 = vpop.f32.mrf.mxu0  ;;  %v1897_v58 = vpop.f32.mrf.mxu1 }
 0x1f4   :  { %2997 = vst [vmem:[#allocation8 + $0x368] sm:$0xff] %v2853_v20  ;;  %v2855_v35 = vadd.f32 %v3982_v29, %v1788_v2  ;;  %v1790_v61 = vadd.f32 %v4203_v46, %v1516_v44 }
 0x1f5   :  { %v1520_v50 = vpop.f32.mrf.mxu0  ;;  %v4333_v25 = vpop.f32.mrf.mxu1 }
 0x1f6   :  { %2999 = vst [vmem:[#allocation8 + $0x378] sm:$0xff] %v2855_v35  ;;  %v2856_v39 = vadd.f32 %v3989_v36, %v1790_v61  ;;  %v1794_v24 = vadd.f32 %v4208_v49, %v1520_v50 }
 0x1f7   :  { %v1522_v51 = vpop.f32.mrf.mxu0  ;;  %v1902_v15 = vpop.f32.mrf.mxu1 }
 0x1f8   :  { %3000 = vst [vmem:[#allocation8 + $0x380] sm:$0xff] %v2856_v39  ;;  %v2858_v56 = vadd.f32 %v3982_v29, %v1794_v24  ;;  %v1796_v10 = vadd.f32 %v4214_v53, %v1522_v51 }
 0x1f9   :  { %v1524_v33 = vpop.f32.mrf.mxu0  ;;  %v4339_v30 = vpop.f32.mrf.mxu1 }
 0x1fa   :  { %3002 = vst [vmem:[#allocation8 + $0x390] sm:$0xff] %v2858_v56  ;;  %v2859_v46 = vadd.f32 %v3989_v36, %v1796_v10  ;;  %v1798_v31 = vadd.f32 %v4218_v48, %v1524_v33 }
 0x1fb   :  { %v1526_v17 = vpop.f32.mrf.mxu0  ;;  %v1905_v40 = vpop.f32.mrf.mxu1 }
 0x1fc   :  { %3003 = vst [vmem:[#allocation8 + $0x398] sm:$0xff] %v2859_v46  ;;  %v2861_v49 = vadd.f32 %v3982_v29, %v1798_v31  ;;  %v1800_v26 = vadd.f32 %v4222_v14, %v1526_v17 }
 0x1fd   :  { %v1530_v4 = vpop.f32.mrf.mxu0  ;;  %v4345_v12 = vpop.f32.mrf.mxu1 }
 0x1fe   :  { %3005 = vst [vmem:[#allocation8 + $0x3a8] sm:$0xff] %v2861_v49  ;;  %v2862_v53 = vadd.f32 %v3989_v36, %v1800_v26  ;;  %v1804_v55 = vadd.f32 %v4226_v32, %v1530_v4 }
 0x1ff   :  { %v1532_v27 = vpop.f32.mrf.mxu0  ;;  %v1910_v9 = vpop.f32.mrf.mxu1 }
 0x200   :  { %3006 = vst [vmem:[#allocation8 + $0x3b0] sm:$0xff] %v2862_v53  ;;  %v2864_v48 = vadd.f32 %v3982_v29, %v1804_v55  ;;  %v1806_v21 = vadd.f32 %v4232_v62, %v1532_v27 }
 0x201   :  { %v1534_v59 = vpop.f32.mrf.mxu0  ;;  %v4351_v28 = vpop.f32.mrf.mxu1 }
 0x202   :  { %3008 = vst [vmem:[#allocation8 + $0x3c0] sm:$0xff] %v2864_v48  ;;  %v2865_v14 = vadd.f32 %v3989_v36, %v1806_v21  ;;  %v1808_v63 = vadd.f32 %v4236_v6, %v1534_v59  ;;  %v4577_v59 = vld [vmem:[#allocation41_spill] sm:$0xff] }
 0x203   :  { %v1536_v5 = vpop.f32.mrf.mxu0  ;;  %v1913_v8 = vpop.f32.mrf.mxu1 }
 0x204   :  { %3009 = vst [vmem:[#allocation8 + $0x3c8] sm:$0xff] %v2865_v14  ;;  %v2867_v32 = vadd.f32 %v3982_v29, %v1808_v63  ;;  %v1810_v3 = vadd.f32 %v4240_v57, %v1536_v5  ;;  %v2739_v14 = vsub.s32 2, %v4577_v59 }
 0x205   :  { %v1540_v7 = vpop.f32.mrf.mxu0  ;;  %v4357_v42 = vpop.f32.mrf.mxu1 }
 0x206   :  { %3011 = vst [vmem:[#allocation8 + $0x3d8] sm:$0xff] %v2867_v32  ;;  %v2868_v62 = vadd.f32 %v3989_v36, %v1810_v3  ;;  %v1814_v22 = vadd.f32 %v4244_v45, %v1540_v7 }
 0x207   :  { %v1542_v20 = vpop.f32.mrf.mxu0  ;;  %v1918_v44 = vpop.f32.mrf.mxu1 }
 0x208   :  { %3012 = vst [vmem:[#allocation8 + $0x3e0] sm:$0xff] %v2868_v62  ;;  %v2870_v6 = vadd.f32 %v3982_v29, %v1814_v22  ;;  %v1816_v2 = vadd.f32 %v4250_v34, %v1542_v20 }
 0x209   :  { %v1544_v35 = vpop.f32.mrf.mxu0  ;;  %v4363_v58 = vpop.f32.mrf.mxu1 }
 0x20a   :  { %3014 = vst [vmem:[#allocation8 + $0x3f0] sm:$0xff] %v2870_v6  ;;  %v2871_v57 = vadd.f32 %v3989_v36, %v1816_v2  ;;  %v1818_v61 = vadd.f32 %v4254_v23, %v1544_v35 }
 0x20b   :  { %v1546_v50 = vpop.f32.mrf.mxu0  ;;  %v1921_v24 = vpop.f32.mrf.mxu1 }
 0x20c   :  { %3015 = vst [vmem:[#allocation8 + $0x3f8] sm:$0xff] %v2871_v57  ;;  %v2873_v45 = vadd.f32 %v3982_v29, %v1818_v61  ;;  %v1820_v39 = vadd.f32 %v4258_v41, %v1546_v50 }
 0x20d   :  { %v1550_v51 = vpop.f32.mrf.mxu0  ;;  %v4369_v10 = vpop.f32.mrf.mxu1 }
 0x20e   :  { %3017 = vst [vmem:[#allocation8 + $0x408] sm:$0xff] %v2873_v45  ;;  %v2874_v34 = vadd.f32 %v3989_v36, %v1820_v39  ;;  %v1824_v56 = vadd.f32 %v4262_v43, %v1550_v51 }
 0x20f   :  { %v1552_v15 = vpop.f32.mrf.mxu0  ;;  %v1926_v46 = vpop.f32.mrf.mxu1 }
 0x210   :  { %3018 = vst [vmem:[#allocation8 + $0x410] sm:$0xff] %v2874_v34  ;;  %v2876_v23 = vadd.f32 %v3982_v29, %v1824_v56  ;;  %v1826_v33 = vadd.f32 %v4268_v11, %v1552_v15 }
 0x211   :  { %v1554_v31 = vpop.f32.mrf.mxu0  ;;  %v4375_v49 = vpop.f32.mrf.mxu1 }
 0x212   :  { %3020 = vst [vmem:[#allocation8 + $0x420] sm:$0xff] %v2876_v23  ;;  %v2877_v41 = vadd.f32 %v3989_v36, %v1826_v33  ;;  %v1828_v17 = vadd.f32 %v4272_v60, %v1554_v31 }
 0x213   :  { %v1556_v26 = vpop.f32.mrf.mxu0  ;;  %v1929_v4 = vpop.f32.mrf.mxu1 }
 0x214   :  { %3021 = vst [vmem:[#allocation8 + $0x428] sm:$0xff] %v2877_v41  ;;  %v2879_v43 = vadd.f32 %v3982_v29, %v1828_v17  ;;  %v1830_v40 = vadd.f32 %v4276_v1, %v1556_v26 }
 0x215   :  { %v1560_v53 = vpop.f32.mrf.mxu0  ;;  %v4381_v27 = vpop.f32.mrf.mxu1 }
 0x216   :  { %3023 = vst [vmem:[#allocation8 + $0x438] sm:$0xff] %v2879_v43  ;;  %v2880_v11 = vadd.f32 %v3989_v36, %v1830_v40  ;;  %v1834_v55 = vadd.f32 %v4280_v52, %v1560_v53 }
 0x217   :  { %v1562_v48 = vpop.f32.mrf.mxu0  ;;  %v1934_v9 = vpop.f32.mrf.mxu1 }
 0x218   :  { %3024 = vst [vmem:[#allocation8 + $0x440] sm:$0xff] %v2880_v11  ;;  %v2882_v60 = vadd.f32 %v3982_v29, %v1834_v55  ;;  %v1836_v21 = vadd.f32 %v4285_v54, %v1562_v48  ;;  %v3553_v54 = vld [vmem:[%s4479_s2] sm:$0x7]  ;;  %s3624_s2 = smov [#allocation8]  }
 0x219   :  { %v1564_v63 = vpop.f32.mrf.mxu0  ;;  %v4388_v32 = vpop.f32.mrf.mxu1  ;;  %v4395_v62 = vrot.slane %v3553_v54, %v2739_v14  ;;  %s3037_s26 = sshll.u32 %s3624_s2, 4  ;;  %s3038_s26 = int_to_ptr.vmem [resolvable:$true] %s3037_s26 }
 0x21a   :  { %3026 = vst [vmem:[#allocation8 + $0x450] sm:$0xff] %v2882_v60  ;;  %v2883_v1 = vadd.f32 %v3989_v36, %v1836_v21  ;;  %v1838_v5 = vadd.f32 %v4289_v38, %v1564_v63  ;;  %s3594_s27 = scalar_lea.vmem %s3038_s26, 18432  ;;  %p3599_p11 = scmp.lt.s32.totalorder %s3038_s26, %s3038_s26 }
 0x21b   :  { %v1566_v52 = vpop.f32.mrf.mxu0  ;;  %v1937_v7 = vpop.f32.mrf.mxu1  ;;  %p3595_p10 = scmp.ne.s32.totalorder %s3038_s26, %s3594_s27  ;;  %p3600_p12 = scmp.lt.s32.totalorder %s3594_s27, %s3594_s27 }
 0x21c   :  { %3027 = vst [vmem:[#allocation8 + $0x458] sm:$0xff] %v2883_v1  ;;  %v2885_v3 = vadd.f32 %v3982_v29, %v1838_v5  ;;  %v1840_v8 = vadd.f32 %v4293_v0, %v1566_v52 }
 0x21d   :  { %v3308_v22 = vpop.f32.mrf.mxu0  ;;  %v4398_v38 = vpop.f32.mrf.mxu1  ;;  %p3601_p13 = por %p3600_p12, %p3599_p11 }
 0x21e   :  { %3029 = vst [vmem:[#allocation8 + $0x468] sm:$0xff] %v2885_v3  ;;  %v2886_v20 = vadd.f32 %v3989_v36, %v1840_v8  ;;  %v2110_v6 = vadd.f32 %v3308_v22, %v4309_v13 }
 0x21f   :  { %v2101_v2 = vpop.f32.mrf.mxu0  ;;  %v1942_v0 = vpop.f32.mrf.mxu1  ;;  %p3602_p0 = pnand %p3601_p13, %p3595_p10 }
 0x220   :  { %3030 = vst [vmem:[#allocation8 + $0x470] sm:$0xff] %v2886_v20  ;;  %v2752_v29 = vadd.f32 %v4395_v62, %v2110_v6  ;;  %v2102_v44 = vadd.f32 %v2101_v2, %v4297_v16 }
 0x221   :  { %v3309_v35 = vpop.f32.mrf.mxu0  ;;  %v4404_v61 = vpop.f32.mrf.mxu1 }
 0x222   :  { %2896 = vst [vmem:[#allocation8 + $0x40] sm:$0xff] %v2752_v29  ;;  %v2746_v57 = vadd.f32 %v4395_v62, %v2102_v44  ;;  %v2113_v50 = vadd.f32 %v3309_v35, %v4315_v37 }
 0x223   :  { %v2104_v36 = vpop.f32.mrf.mxu0  ;;  %v1945_v13 = vpop.f32.mrf.mxu1 }
 0x224   :  { %2890 = vst [vmem:[#allocation8 + $0x10] sm:$0xff] %v2746_v57  ;;  %v2755_v45 = vadd.f32 %v4395_v62, %v2113_v50  ;;  %v2105_v39 = vadd.f32 %v2104_v36, %v4303_v18 }
 0x225   :  { %v3312_v24 = vpop.f32.mrf.mxu0  ;;  %v1948_v16 = vpop.f32.mrf.mxu1 }
 0x226   :  { %2899 = vst [vmem:[#allocation8 + $0x58] sm:$0xff] %v2755_v45  ;;  %v2749_v51 = vadd.f32 %v4395_v62, %v2105_v39  ;;  %v2126_v34 = vadd.f32 %v3312_v24, %v4333_v25 }
 0x227   :  { %v2117_v56 = vpop.f32.mrf.mxu0  ;;  %v1950_v23 = vpop.f32.mrf.mxu1 }
 0x228   :  { %2893 = vst [vmem:[#allocation8 + $0x28] sm:$0xff] %v2749_v51  ;;  %v2764_v15 = vadd.f32 %v4395_v62, %v2126_v34  ;;  %v2118_v37 = vadd.f32 %v2117_v56, %v4321_v47 }
 0x229   :  { %v3313_v33 = vpop.f32.mrf.mxu0  ;;  %v1951_v31 = vpop.f32.mrf.mxu1 }
 0x22a   :  { %2908 = vst [vmem:[#allocation8 + $0xa0] sm:$0xff] %v2764_v15  ;;  %v2758_v46 = vadd.f32 %v4395_v62, %v2118_v37  ;;  %v2129_v18 = vadd.f32 %v3313_v33, %v4339_v30 }
 0x22b   :  { %v2120_v41 = vpop.f32.mrf.mxu0  ;;  %v1953_v26 = vpop.f32.mrf.mxu1 }
 0x22c   :  { %2902 = vst [vmem:[#allocation8 + $0x70] sm:$0xff] %v2758_v46  ;;  %v2767_v17 = vadd.f32 %v4395_v62, %v2129_v18  ;;  %v2121_v25 = vadd.f32 %v2120_v41, %v4327_v19 }
 0x22d   :  { %v3316_v43 = vpop.f32.mrf.mxu0  ;;  %v4418_v4 = vpop.f32.mrf.mxu1 }
 0x22e   :  { %2911 = vst [vmem:[#allocation8 + $0xb8] sm:$0xff] %v2767_v17  ;;  %v2761_v40 = vadd.f32 %v4395_v62, %v2121_v25  ;;  %v2142_v47 = vadd.f32 %v3316_v43, %v4357_v42 }
 0x22f   :  { %v2133_v53 = vpop.f32.mrf.mxu0  ;;  %v1958_v30 = vpop.f32.mrf.mxu1 }
 0x230   :  { %2905 = vst [vmem:[#allocation8 + $0x88] sm:$0xff] %v2761_v40  ;;  %v2776_v11 = vadd.f32 %v4395_v62, %v2142_v47  ;;  %v2134_v55 = vadd.f32 %v2133_v53, %v4345_v12 }
 0x231   :  { %v3317_v48 = vpop.f32.mrf.mxu0  ;;  %v4424_v19 = vpop.f32.mrf.mxu1 }
 0x232   :  { %2920 = vst [vmem:[#allocation8 + $0x100] sm:$0xff] %v2776_v11  ;;  %v2770_v60 = vadd.f32 %v4395_v62, %v2134_v55  ;;  %v2145_v21 = vadd.f32 %v3317_v48, %v4363_v58 }
 0x233   :  { %v2136_v9 = vpop.f32.mrf.mxu0  ;;  %v1961_v42 = vpop.f32.mrf.mxu1 }
 0x234   :  { %2914 = vst [vmem:[#allocation8 + $0xd0] sm:$0xff] %v2770_v60  ;;  %v2779_v59 = vadd.f32 %v4395_v62, %v2145_v21  ;;  %v2137_v14 = vadd.f32 %v2136_v9, %v4351_v28 }
 0x235   :  { %v3320_v63 = vpop.f32.mrf.mxu0  ;;  %v1964_v12 = vpop.f32.mrf.mxu1 }
 0x236   :  { %2923 = vst [vmem:[#allocation8 + $0x118] sm:$0xff] %v2779_v59  ;;  %v2773_v1 = vadd.f32 %v4395_v62, %v2137_v14  ;;  %v2158_v5 = vadd.f32 %v3320_v63, %v4381_v27 }
 0x237   :  { %v2149_v52 = vpop.f32.mrf.mxu0  ;;  %v1966_v8 = vpop.f32.mrf.mxu1 }
 0x238   :  { %2917 = vst [vmem:[#allocation8 + $0xe8] sm:$0xff] %v2773_v1  ;;  %v2788_v3 = vadd.f32 %v4395_v62, %v2158_v5  ;;  %v2150_v58 = vadd.f32 %v2149_v52, %v4369_v10 }
 0x239   :  { %v3321_v7 = vpop.f32.mrf.mxu0  ;;  %v1967_v22 = vpop.f32.mrf.mxu1 }
 0x23a   :  { %2932 = vst [vmem:[#allocation8 + $0x160] sm:$0xff] %v2788_v3  ;;  %v2782_v54 = vadd.f32 %v4395_v62, %v2150_v58  ;;  %v2161_v28 = vadd.f32 %v3321_v7, %v4388_v32 }
 0x23b   :  { %v2152_v20 = vpop.f32.mrf.mxu0  ;;  %v1969_v2 = vpop.f32.mrf.mxu1 }
 0x23c   :  { %2926 = vst [vmem:[#allocation8 + $0x130] sm:$0xff] %v2782_v54  ;;  %v2791_v6 = vadd.f32 %v4395_v62, %v2161_v28  ;;  %v2153_v27 = vadd.f32 %v2152_v20, %v4375_v49 }
 0x23d   :  { %v3324_v29 = vpop.f32.mrf.mxu0  ;;  %v1972_v44 = vpop.f32.mrf.mxu1 }
 0x23e   :  { %2935 = vst [vmem:[#allocation8 + $0x178] sm:$0xff] %v2791_v6  ;;  %v2785_v0 = vadd.f32 %v4395_v62, %v2153_v27  ;;  %v2174_v10 = vadd.f32 %v3324_v29, %v1948_v16 }
 0x23f   :  { %v2165_v35 = vpop.f32.mrf.mxu0  ;;  %v1974_v50 = vpop.f32.mrf.mxu1 }
 0x240   :  { %2929 = vst [vmem:[#allocation8 + $0x148] sm:$0xff] %v2785_v0  ;;  %v2800_v57 = vadd.f32 %v4395_v62, %v2174_v10  ;;  %v2166_v32 = vadd.f32 %v2165_v35, %v4398_v38 }
 0x241   :  { %v3325_v36 = vpop.f32.mrf.mxu0  ;;  %v1975_v13 = vpop.f32.mrf.mxu1 }
 0x242   :  { %2944 = vst [vmem:[#allocation8 + $0x1c0] sm:$0xff] %v2800_v57  ;;  %v2794_v45 = vadd.f32 %v4395_v62, %v2166_v32  ;;  %v2177_v39 = vadd.f32 %v3325_v36, %v1951_v31 }
 0x243   :  { %v2168_v49 = vpop.f32.mrf.mxu0  ;;  %v1977_v51 = vpop.f32.mrf.mxu1 }
 0x244   :  { %2938 = vst [vmem:[#allocation8 + $0x190] sm:$0xff] %v2794_v45  ;;  %v2803_v24 = vadd.f32 %v4395_v62, %v2177_v39  ;;  %v2169_v16 = vadd.f32 %v2168_v49, %v4404_v61 }
 0x245   :  { %v3328_v34 = vpop.f32.mrf.mxu0  ;;  %v1980_v15 = vpop.f32.mrf.mxu1 }
 0x246   :  { %2947 = vst [vmem:[#allocation8 + $0x1d8] sm:$0xff] %v2803_v24  ;;  %v2797_v56 = vadd.f32 %v4395_v62, %v2169_v16  ;;  %v2190_v23 = vadd.f32 %v3328_v34, %v1964_v12 }
 0x247   :  { %v2181_v38 = vpop.f32.mrf.mxu0  ;;  %v1982_v33 = vpop.f32.mrf.mxu1 }
 0x248   :  { %2941 = vst [vmem:[#allocation8 + $0x1a8] sm:$0xff] %v2797_v56  ;;  %v2812_v37 = vadd.f32 %v4395_v62, %v2190_v23  ;;  %v2182_v46 = vadd.f32 %v2181_v38, %v4418_v4 }
 0x249   :  { %v3329_v31 = vpop.f32.mrf.mxu0  ;;  %v1983_v41 = vpop.f32.mrf.mxu1 }
 0x24a   :  { %2956 = vst [vmem:[#allocation8 + $0x220] sm:$0xff] %v2812_v37  ;;  %v2806_v18 = vadd.f32 %v4395_v62, %v2182_v46  ;;  %v2193_v17 = vadd.f32 %v3329_v31, %v1967_v22 }
 0x24b   :  { %v2184_v61 = vpop.f32.mrf.mxu0  ;;  %v1985_v25 = vpop.f32.mrf.mxu1 }
 0x24c   :  { %2950 = vst [vmem:[#allocation8 + $0x1f0] sm:$0xff] %v2806_v18  ;;  %v2815_v26 = vadd.f32 %v4395_v62, %v2193_v17  ;;  %v2185_v43 = vadd.f32 %v2184_v61, %v4424_v19 }
 0x24d   :  { %v3332_v40 = vpop.f32.mrf.mxu0  ;;  %v1988_v53 = vpop.f32.mrf.mxu1 }
 0x24e   :  { %2959 = vst [vmem:[#allocation8 + $0x238] sm:$0xff] %v2815_v26  ;;  %v2809_v47 = vadd.f32 %v4395_v62, %v2185_v43  ;;  %v2206_v11 = vadd.f32 %v3332_v40, %v1980_v15 }
 0x24f   :  { %v2197_v4 = vpop.f32.mrf.mxu0  ;;  %v1990_v55 = vpop.f32.mrf.mxu1 }
 0x250   :  { %2953 = vst [vmem:[#allocation8 + $0x208] sm:$0xff] %v2809_v47  ;;  %v2824_v30 = vadd.f32 %v4395_v62, %v2206_v11  ;;  %v2198_v48 = vadd.f32 %v2197_v4, %v1972_v44 }
 0x251   :  { %v3333_v60 = vpop.f32.mrf.mxu0  ;;  %v1991_v9 = vpop.f32.mrf.mxu1 }
 0x252   :  { %2968 = vst [vmem:[#allocation8 + $0x280] sm:$0xff] %v2824_v30  ;;  %v2818_v21 = vadd.f32 %v4395_v62, %v2198_v48  ;;  %v2209_v59 = vadd.f32 %v3333_v60, %v1983_v41 }
 0x253   :  { %v2200_v42 = vpop.f32.mrf.mxu0  ;;  %v1993_v14 = vpop.f32.mrf.mxu1 }
 0x254   :  { %2962 = vst [vmem:[#allocation8 + $0x250] sm:$0xff] %v2818_v21  ;;  %v2827_v19 = vadd.f32 %v4395_v62, %v2209_v59  ;;  %v2201_v63 = vadd.f32 %v2200_v42, %v1975_v13 }
 0x255   :  { %v3336_v1 = vpop.f32.mrf.mxu0  ;;  %v1996_v5 = vpop.f32.mrf.mxu1 }
 0x256   :  { %2971 = vst [vmem:[#allocation8 + $0x298] sm:$0xff] %v2827_v19  ;;  %v2821_v12 = vadd.f32 %v4395_v62, %v2201_v63  ;;  %v2222_v52 = vadd.f32 %v3336_v1, %v1996_v5 }
 0x257   :  { %v2213_v3 = vpop.f32.mrf.mxu0  ;;  %v1998_v8 = vpop.f32.mrf.mxu1 }
 0x258   :  { %2965 = vst [vmem:[#allocation8 + $0x268] sm:$0xff] %v2821_v12  ;;  %v2214_v58 = vadd.f32 %v2213_v3, %v1988_v53  ;;  %v2836_v7 = vadd.f32 %v4395_v62, %v2222_v52 }
 0x259   :  { %v3337_v54 = vpop.f32.mrf.mxu0  ;;  %v1999_v28 = vpop.f32.mrf.mxu1 }
 0x25a   :  { %v2830_v22 = vadd.f32 %v4395_v62, %v2214_v58  ;;  %2980 = vst [vmem:[#allocation8 + $0x2e0] sm:$0xff] %v2836_v7  ;;  %v2225_v20 = vadd.f32 %v3337_v54, %v1999_v28 }
 0x25b   :  { %v2216_v6 = vpop.f32.mrf.mxu0  ;;  %v2001_v2 = vpop.f32.mrf.mxu1 }
 0x25c   :  { %2974 = vst [vmem:[#allocation8 + $0x2b0] sm:$0xff] %v2830_v22  ;;  %v2217_v27 = vadd.f32 %v2216_v6, %v1991_v9  ;;  %v2839_v29 = vadd.f32 %v4395_v62, %v2225_v20 }
 0x25d   :  { %v3340_v0 = vpop.f32.mrf.mxu0  ;;  %v2004_v10 = vpop.f32.mrf.mxu1 }
 0x25e   :  { %v2833_v44 = vadd.f32 %v4395_v62, %v2217_v27  ;;  %2983 = vst [vmem:[#allocation8 + $0x2f8] sm:$0xff] %v2839_v29 }
 0x25f   :  { %v2229_v35 = vpop.f32.mrf.mxu0  ;;  %v2006_v57 = vpop.f32.mrf.mxu1 }
 0x260   :  { %2977 = vst [vmem:[#allocation8 + $0x2c8] sm:$0xff] %v2833_v44  ;;  %v2230_v50 = vadd.f32 %v2229_v35, %v2004_v10 }
 0x261   :  { %v3341_v32 = vpop.f32.mrf.mxu0  ;;  %v2007_v45 = vpop.f32.mrf.mxu1 }
 0x262   :  { %v2842_v36 = vadd.f32 %v4395_v62, %v2230_v50 }
 0x263   :  { %v2232_v13 = vpop.f32.mrf.mxu0  ;;  %v2009_v39 = vpop.f32.mrf.mxu1 }
 0x264   :  { %2986 = vst [vmem:[#allocation8 + $0x310] sm:$0xff] %v2842_v36  ;;  %v2233_v49 = vadd.f32 %v2232_v13, %v2007_v45 }
 0x265   :  { %v3344_v24 = vpop.f32.mrf.mxu0  ;;  %v2012_v16 = vpop.f32.mrf.mxu1 }
 0x266   :  { %v2845_v51 = vadd.f32 %v4395_v62, %v2233_v49  ;;  %v2238_v34 = vadd.f32 %v3340_v0, %v2012_v16 }
 0x267   :  { %v2014_v56 = vpop.f32.mrf.mxu1  ;;  %v2245_v15 = vpop.f32.mrf.mxu0 }
 0x268   :  { %2989 = vst [vmem:[#allocation8 + $0x328] sm:$0xff] %v2845_v51  ;;  %v2848_v23 = vadd.f32 %v4395_v62, %v2238_v34 }
 0x269   :  { %v2015_v38 = vpop.f32.mrf.mxu1  ;;  %v3345_v46 = vpop.f32.mrf.mxu0 }
 0x26a   :  { %2992 = vst [vmem:[#allocation8 + $0x340] sm:$0xff] %v2848_v23  ;;  %v2241_v37 = vadd.f32 %v3341_v32, %v2015_v38 }
 0x26b   :  { %v2017_v33 = vpop.f32.mrf.mxu1  ;;  %v2248_v61 = vpop.f32.mrf.mxu0 }
 0x26c   :  { %v2851_v31 = vadd.f32 %v4395_v62, %v2241_v37 }
 0x26d   :  { %v2020_v18 = vpop.f32.mrf.mxu1  ;;  %v3348_v47 = vpop.f32.mrf.mxu0 }
 0x26e   :  { %2995 = vst [vmem:[#allocation8 + $0x358] sm:$0xff] %v2851_v31  ;;  %v2246_v41 = vadd.f32 %v2245_v15, %v2020_v18 }
 0x26f   :  { %v2022_v17 = vpop.f32.mrf.mxu1  ;;  %v2261_v55 = vpop.f32.mrf.mxu0 }
 0x270   :  { %v2854_v26 = vadd.f32 %v4395_v62, %v2246_v41 }
 0x271   :  { %v2023_v25 = vpop.f32.mrf.mxu1  ;;  %v3349_v59 = vpop.f32.mrf.mxu0 }
 0x272   :  { %2998 = vst [vmem:[#allocation8 + $0x370] sm:$0xff] %v2854_v26  ;;  %v2249_v43 = vadd.f32 %v2248_v61, %v2023_v25 }
 0x273   :  { %v2025_v40 = vpop.f32.mrf.mxu1  ;;  %v2264_v1 = vpop.f32.mrf.mxu0 }
 0x274   :  { %v2857_v53 = vadd.f32 %v4395_v62, %v2249_v43 }
 0x275   :  { %v2028_v11 = vpop.f32.mrf.mxu1  ;;  %v3352_v8 = vpop.f32.mrf.mxu0 }
 0x276   :  { %3001 = vst [vmem:[#allocation8 + $0x388] sm:$0xff] %v2857_v53  ;;  %v2254_v4 = vadd.f32 %v3344_v24, %v2028_v11 }
 0x277   :  { %v2030_v30 = vpop.f32.mrf.mxu1  ;;  %v2277_v28 = vpop.f32.mrf.mxu0 }
 0x278   :  { %v2860_v48 = vadd.f32 %v4395_v62, %v2254_v4 }
 0x279   :  { %v2031_v60 = vpop.f32.mrf.mxu1  ;;  %v3353_v29 = vpop.f32.mrf.mxu0 }
 0x27a   :  { %3004 = vst [vmem:[#allocation8 + $0x3a0] sm:$0xff] %v2860_v48  ;;  %v2257_v21 = vadd.f32 %v3345_v46, %v2031_v60 }
 0x27b   :  { %v2033_v9 = vpop.f32.mrf.mxu1  ;;  %v2280_v57 = vpop.f32.mrf.mxu0 }
 0x27c   :  { %v2863_v42 = vadd.f32 %v4395_v62, %v2257_v21 }
 0x27d   :  { %v2036_v19 = vpop.f32.mrf.mxu1 }
 0x27e   :  { %3007 = vst [vmem:[#allocation8 + $0x3b8] sm:$0xff] %v2863_v42  ;;  %v2262_v14 = vadd.f32 %v2261_v55, %v2036_v19 }
 0x27f   :  { %v2038_v63 = vpop.f32.mrf.mxu1 }
 0x280   :  { %v2866_v12 = vadd.f32 %v4395_v62, %v2262_v14 }
 0x281   :  { %v2039_v5 = vpop.f32.mrf.mxu1 }
 0x282   :  { %3010 = vst [vmem:[#allocation8 + $0x3d0] sm:$0xff] %v2866_v12  ;;  %v2265_v52 = vadd.f32 %v2264_v1, %v2039_v5 }
 0x283   :  { %v2041_v3 = vpop.f32.mrf.mxu1 }
 0x284   :  { %v2869_v58 = vadd.f32 %v4395_v62, %v2265_v52 }
 0x285   :  { %v2044_v7 = vpop.f32.mrf.mxu1 }
 0x286   :  { %3013 = vst [vmem:[#allocation8 + $0x3e8] sm:$0xff] %v2869_v58  ;;  %v2270_v54 = vadd.f32 %v3348_v47, %v2044_v7 }
 0x287   :  { %v2046_v22 = vpop.f32.mrf.mxu1 }
 0x288   :  { %v2872_v20 = vadd.f32 %v4395_v62, %v2270_v54 }
 0x289   :  { %v2047_v6 = vpop.f32.mrf.mxu1 }
 0x28a   :  { %3016 = vst [vmem:[#allocation8 + $0x400] sm:$0xff] %v2872_v20  ;;  %v2273_v2 = vadd.f32 %v3349_v59, %v2047_v6 }
 0x28b   :  { %v2049_v27 = vpop.f32.mrf.mxu1 }
 0x28c   :  { %v2875_v0 = vadd.f32 %v4395_v62, %v2273_v2 }
 0x28d   :  { %v2052_v44 = vpop.f32.mrf.mxu1 }
 0x28e   :  { %3019 = vst [vmem:[#allocation8 + $0x418] sm:$0xff] %v2875_v0  ;;  %v2278_v10 = vadd.f32 %v2277_v28, %v2052_v44 }
 0x28f   :  { %v2054_v35 = vpop.f32.mrf.mxu1 }
 0x290   :  { %v2878_v50 = vadd.f32 %v4395_v62, %v2278_v10 }
 0x291   :  { %v2055_v32 = vpop.f32.mrf.mxu1 }
 0x292   :  { %3022 = vst [vmem:[#allocation8 + $0x430] sm:$0xff] %v2878_v50  ;;  %v2281_v36 = vadd.f32 %v2280_v57, %v2055_v32 }
 0x293   :  { %v2057_v45 = vpop.f32.mrf.mxu1 }
 0x294   :  { %v2881_v13 = vadd.f32 %v4395_v62, %v2281_v36 }
 0x295   :  { %v2060_v39 = vpop.f32.mrf.mxu1 }
 0x296   :  { %3025 = vst [vmem:[#allocation8 + $0x448] sm:$0xff] %v2881_v13  ;;  %v2286_v49 = vadd.f32 %v3352_v8, %v2060_v39 }
 0x297   :  { %v2062_v24 = vpop.f32.mrf.mxu1 }
 0x298   :  { %v2884_v51 = vadd.f32 %v4395_v62, %v2286_v49 }
 0x299   :  { %v2063_v16 = vpop.f32.mrf.mxu1 }
 0x29a   :  { %3028 = vst [vmem:[#allocation8 + $0x460] sm:$0xff] %v2884_v51  ;;  %v2289_v34 = vadd.f32 %v3353_v29, %v2063_v16 }
 0x29b   :  { %v2065_v56 = vpop.f32.mrf.mxu1 }
 0x29c   :  { %v2887_v15 = vadd.f32 %v4395_v62, %v2289_v34 }
 0x29e   :  { %3031 = vst [vmem:[#allocation8 + $0x478] sm:$0xff] %v2887_v15 }
 0x29f   :  { %3605 = shalt.err (!%p3602_p0)
}
 0x2a0   :  { %s3625_s28 = smov 384   ;;  %s3626_s29 = smov 24  }
 0x2a1   :  { %3043 = dma.vmem_to_hbm [thread:$0]  %s3038_s26, 18432, %s4480_s3, [#allocation5], %s3625_s28, %s3625_s28, %s3626_s29  }
 0x2a2   :  { %3618 = dma.done.wait [#allocation5], 18432  }
 0x2a3   :  { %3619 = vsyncadd [#allocation5], 4294948864 }
 0x2a4   :  { %3047 = vsyncpa [#allocation4], 1 }
 0x2a5   :  { %3048 = vsyncpa [#allocation7], 1 }
 0x2a6   :  { %3049 = vsyncpa [#allocation5], 1 }

</bundles_post_ra>
